<compile_context>
chip_gen: v7x
topology: tpu7x:2x2x1
jax: 0.10.0
libtpu: 0.0.40
codegen_flags: <defaults>
</compile_context>

<pallas_src>
from functools import partial

import jax
import jax.numpy as jnp
from jax.experimental import pallas as pl
from jax.experimental.pallas import tpu as pltpu

GOAL_IN = 2        # raw goal-sensor features
GOAL_DIMS = 32     # embed_goal output dims
VIT_DIMS = 512     # vit preprocessor feature dims
OUT_DIMS = 1568    # target_obs_combiner output dims


def _encoder_kernel(vit_ref, goal_ref, wv_ref, wgc_ref, bc_ref, out_ref):
    # MXU: (tile_m, 512) @ (512, tile_n), bf16 operands, f32 accumulation.
    a = vit_ref[...].astype(jnp.bfloat16)
    acc = jnp.dot(a, wv_ref[...], preferred_element_type=jnp.float32)
    # Folded goal contribution + folded bias on the VPU, kept in f32.
    # (wgc is tiny, so it stays f32 to avoid an extra in-kernel cast.)
    g = goal_ref[...]                         # (tile_m, 2) f32
    wgc = wgc_ref[...]                        # (2, tile_n) f32
    corr = g[:, 0:1] * wgc[0:1, :] + (g[:, 1:2] * wgc[1:2, :] + bc_ref[...])
    out_ref[...] = (acc + corr).astype(out_ref.dtype)


def _pick_tiles(n):
    """Row/column tile sizes.

    Small N (one row tile): tile the 1568 output columns so the bf16 weight
    DMA streams in pipelined 256-wide chunks and v7x's second TensorCore gets
    work.  Large N: full-width output blocks so the weights are grid-invariant
    (DMA'd once) and output stores are lane-dense.
    """
    if n <= 256:
        tile_m = max(8, ((n + 7) // 8) * 8)   # single sublane-aligned row tile
        tile_n = 256                          # 7 column tiles (last one masked)
    else:
        if n >= 1024:
            tile_m = 512
        elif n >= 512:
            tile_m = 256
        else:
            tile_m = 128
        tile_n = OUT_DIMS
    return tile_m, tile_n


@partial(jax.jit, static_argnames=("tile_m", "tile_n"))
def _encoder_call(vit_flat, goal_flat, wv, wgc, bc, *, tile_m, tile_n):
    """vit_flat: (N, 512) f32, goal_flat: (N, 2) f32 -> (N, 1568) f32."""
    n = vit_flat.shape[0]
    grid = (pl.cdiv(n, tile_m), pl.cdiv(OUT_DIMS, tile_n))

    cost = pl.CostEstimate(
        flops=2 * n * VIT_DIMS * OUT_DIMS + 6 * n * OUT_DIMS,
        transcendentals=0,
        bytes_accessed=(4 * n * (VIT_DIMS + GOAL_IN + OUT_DIMS)   # acts f32
                        + 2 * VIT_DIMS * OUT_DIMS                 # wv bf16
                        + 4 * (GOAL_IN + 1) * OUT_DIMS),          # wgc/bc f32
    )

    return pl.pallas_call(
        _encoder_kernel,
        out_shape=jax.ShapeDtypeStruct((n, OUT_DIMS), jnp.float32),
        grid_spec=pltpu.PrefetchScalarGridSpec(
            num_scalar_prefetch=0,
            grid=grid,
            in_specs=[
                pl.BlockSpec((tile_m, VIT_DIMS), lambda i, j: (i, 0)),   # vit rows
                pl.BlockSpec((tile_m, GOAL_IN), lambda i, j: (i, 0)),    # goal rows
                pl.BlockSpec((VIT_DIMS, tile_n), lambda i, j: (0, j)),   # W[:512] (bf16)
                pl.BlockSpec((GOAL_IN, tile_n), lambda i, j: (0, j)),    # folded goal W
                pl.BlockSpec((1, tile_n), lambda i, j: (0, j)),          # folded bias
            ],
            out_specs=pl.BlockSpec((tile_m, tile_n), lambda i, j: (i, j)),
        ),
        compiler_params=pltpu.CompilerParams(
            dimension_semantics=("parallel", "parallel"),
            vmem_limit_bytes=32 * 1024 * 1024,
        ),
        cost_estimate=cost,
    )(vit_flat, goal_flat, wv, wgc, bc)


def vit_goal_encoder_forward(vit_flat, goal_flat, folded_params):
    tile_m, tile_n = _pick_tiles(vit_flat.shape[0])
    return _encoder_call(vit_flat, goal_flat,
                         folded_params["wv"], folded_params["wgc"],
                         folded_params["bc"], tile_m=tile_m, tile_n=tile_n)


def init_params(key):
    """Deterministic synthetic parameters matching nn.Linear shapes."""
    k1, k2, k3, k4 = jax.random.split(key, 4)
    # embed_goal: nn.Linear(2, 32) -> stored transposed as (2, 32)
    lim_g = 1.0 / jnp.sqrt(float(GOAL_IN))
    wg = jax.random.uniform(k1, (GOAL_IN, GOAL_DIMS), jnp.float32, -lim_g, lim_g)
    bg = jax.random.uniform(k2, (1, GOAL_DIMS), jnp.float32, -lim_g, lim_g)
    # target_obs_combiner: nn.Linear(544, 1568) -> stored transposed as (544, 1568)
    lim_c = 1.0 / jnp.sqrt(float(VIT_DIMS + GOAL_DIMS))
    w_full = jax.random.uniform(k3, (VIT_DIMS + GOAL_DIMS, OUT_DIMS),
                                jnp.float32, -lim_c, lim_c)
    b = jax.random.uniform(k4, (1, OUT_DIMS), jnp.float32, -lim_c, lim_c)
    return {
        "wg": wg,                 # embed_goal weight (2, 32)
        "bg": bg,                 # embed_goal bias   (1, 32)
        "wv": w_full[:VIT_DIMS],  # combiner rows hit by vit features (512, 1568)
        "wge": w_full[VIT_DIMS:], # combiner rows hit by goal embedding (32, 1568)
        "b": b,                   # combiner bias (1, 1568)
    }


def fold_params(params):
    """Fold embed_goal into the combiner (exact because both are linear)."""
    wgc = params["wg"] @ params["wge"]                 # (2, 1568) f32 (VPU path)
    bc = params["bg"] @ params["wge"] + params["b"]    # (1, 1568) f32
    return {
        "wv": params["wv"].astype(jnp.bfloat16),       # bf16 MXU operand
        "wgc": wgc,
        "bc": bc,
    }


def forward(observations, folded_params, goal_uuid="goal", vit_uuid="vit"):
    """Full module forward, including adapt_input / adapt_output reshapes."""
    vit = observations[vit_uuid]
    goal = observations[goal_uuid]
    use_agent = False
    nagent = 1
    if vit.ndim == 6:
        use_agent = True
        nstep, nsampler, nagent = vit.shape[:3]
    else:
        nstep, nsampler = vit.shape[:2]
    vit_flat = vit.reshape(-1, VIT_DIMS)
    goal_flat = goal.reshape(-1, GOAL_IN)

    x = vit_goal_encoder_forward(vit_flat, goal_flat, folded_params)

    if use_agent:
        return x.reshape(nstep, nsampler, nagent, -1)
    return x.reshape(nstep, nsampler * nagent, -1)


def reference_forward(vit_flat, goal_flat, params):
    """Plain-JAX f32 reference matching the original (unfolded) PyTorch math."""
    goal_emb = goal_flat @ params["wg"] + params["bg"]
    cat = jnp.concatenate([vit_flat, goal_emb], axis=-1)
    w_full = jnp.concatenate([params["wv"], params["wge"]], axis=0)
    return cat @ w_full + params["b"]


if __name__ == "__main__":
    key = jax.random.PRNGKey(0)
    pkey, vkey, gkey, vkey2, gkey2 = jax.random.split(key, 5)

    params = init_params(pkey)
    folded = fold_params(params)

    def check(vit, goal, out_shape):
        out = forward({"vit": vit, "goal": goal}, folded)
        out = jax.block_until_ready(out)
        assert out.shape == out_shape, out.shape
        ref = reference_forward(vit.reshape(-1, VIT_DIMS),
                                goal.reshape(-1, GOAL_IN),
                                params).reshape(out_shape)
        # bf16 MXU path -> relative tolerance.
        denom = float(jnp.max(jnp.abs(ref))) + 1e-6
        err = float(jnp.max(jnp.abs(out - ref)))
        assert err <= 2e-2 * denom, f"rel err {err / denom}"

    # Case 1: nstep=2, nsampler=8 -> N = 16 flattened samples.
    nstep, nsampler = 2, 8
    vit = jax.random.normal(vkey, (nstep, nsampler, VIT_DIMS), jnp.float32)
    goal = jax.random.normal(gkey, (nstep, nsampler, GOAL_IN), jnp.float32)
    check(vit, goal, (nstep, nsampler, OUT_DIMS))

    # Case 2: ragged N (nstep=3, nsampler=5 -> N=15) exercises the masked
    # last-row-block path (no host-side pad/slice anymore).
    nstep2, nsampler2 = 3, 5
    vit2 = jax.random.normal(vkey2, (nstep2, nsampler2, VIT_DIMS), jnp.float32)
    goal2 = jax.random.normal(gkey2, (nstep2, nsampler2, GOAL_IN), jnp.float32)
    check(vit2, goal2, (nstep2, nsampler2, OUT_DIMS))

    print("KERNEL_OK")
</pallas_src>

<mosaic_0001>
module attributes {stable_mosaic.version = 11 : i64} {
  func.func @_encoder_kernel(%arg0: i32, %arg1: i32, %arg2: memref<16x512xf32, #tpu.memory_space<vmem>>, %arg3: memref<16x2xf32, #tpu.memory_space<vmem>>, %arg4: memref<512x256xbf16, #tpu.memory_space<vmem>>, %arg5: memref<2x256xf32, #tpu.memory_space<vmem>>, %arg6: memref<1x256xf32, #tpu.memory_space<vmem>>, %arg7: memref<16x256xf32, #tpu.memory_space<vmem>>) attributes {dimension_semantics = [#tpu.dimension_semantics<parallel>, #tpu.dimension_semantics<parallel>], iteration_bounds = array<i64: 1, 7>, scalar_prefetch = 0 : i64, scratch_operands = 0 : i64, tpu.core_type = #tpu.core_type<tc>, window_params = [{transform_indices = @transform_0, window_bounds = array<i64: 16, 512>}, {transform_indices = @transform_1, window_bounds = array<i64: 16, 2>}, {transform_indices = @transform_2, window_bounds = array<i64: 512, 256>}, {transform_indices = @transform_3, window_bounds = array<i64: 2, 256>}, {transform_indices = @transform_4, window_bounds = array<i64: 1, 256>}, {transform_indices = @transform_5, window_bounds = array<i64: 16, 256>}]} {
    %c0 = arith.constant 0 : index
    %c0_0 = arith.constant 0 : index
    %0 = vector.load %arg2[%c0, %c0_0] : memref<16x512xf32, #tpu.memory_space<vmem>>, vector<16x512xf32>
    %1 = arith.truncf %0 : vector<16x512xf32> to vector<16x512xbf16>
    %c0_1 = arith.constant 0 : index
    %c0_2 = arith.constant 0 : index
    %2 = vector.load %arg4[%c0_1, %c0_2] : memref<512x256xbf16, #tpu.memory_space<vmem>>, vector<512x256xbf16>
    %cst = arith.constant dense<0.000000e+00> : vector<16x256xf32>
    %3 = tpu.matmul %1, %2, %cst {dimension_numbers = #tpu.dot_dimension_numbers<[1], [0], [0], [1], [0, 0, 1, 1], [], []>} : vector<16x512xbf16>, vector<512x256xbf16>, vector<16x256xf32> -> vector<16x256xf32>
    %c0_3 = arith.constant 0 : index
    %c0_4 = arith.constant 0 : index
    %4 = vector.load %arg3[%c0_3, %c0_4] : memref<16x2xf32, #tpu.memory_space<vmem>>, vector<16x2xf32>
    %c0_5 = arith.constant 0 : index
    %c0_6 = arith.constant 0 : index
    %5 = vector.load %arg5[%c0_5, %c0_6] : memref<2x256xf32, #tpu.memory_space<vmem>>, vector<2x256xf32>
    %6 = vector.extract_strided_slice %4 {offsets = [0, 0], sizes = [16, 1], strides = [1, 1]} : vector<16x2xf32> to vector<16x1xf32>
    %7 = vector.extract_strided_slice %5 {offsets = [0, 0], sizes = [1, 256], strides = [1, 1]} : vector<2x256xf32> to vector<1x256xf32>
    %8 = vector.broadcast %6 : vector<16x1xf32> to vector<16x256xf32>
    %9 = vector.broadcast %7 : vector<1x256xf32> to vector<16x256xf32>
    %10 = arith.mulf %8, %9 : vector<16x256xf32>
    %11 = vector.extract_strided_slice %4 {offsets = [0, 1], sizes = [16, 1], strides = [1, 1]} : vector<16x2xf32> to vector<16x1xf32>
    %12 = vector.extract_strided_slice %5 {offsets = [1, 0], sizes = [1, 256], strides = [1, 1]} : vector<2x256xf32> to vector<1x256xf32>
    %13 = vector.broadcast %11 : vector<16x1xf32> to vector<16x256xf32>
    %14 = vector.broadcast %12 : vector<1x256xf32> to vector<16x256xf32>
    %15 = arith.mulf %13, %14 : vector<16x256xf32>
    %c0_7 = arith.constant 0 : index
    %c0_8 = arith.constant 0 : index
    %16 = vector.load %arg6[%c0_7, %c0_8] : memref<1x256xf32, #tpu.memory_space<vmem>>, vector<1x256xf32>
    %17 = vector.broadcast %16 : vector<1x256xf32> to vector<16x256xf32>
    %18 = arith.addf %15, %17 : vector<16x256xf32>
    %19 = arith.addf %10, %18 : vector<16x256xf32>
    %20 = arith.addf %3, %19 : vector<16x256xf32>
    %c0_9 = arith.constant 0 : index
    %c0_10 = arith.constant 0 : index
    %21 = vector.load %arg7[%c0_9, %c0_10] : memref<16x256xf32, #tpu.memory_space<vmem>>, vector<16x256xf32>
    tpu.vector_store %arg7[%c0_9, %c0_10], %20 {strides = array<i32>} : memref<16x256xf32, #tpu.memory_space<vmem>>, vector<16x256xf32>,
    return
  }
  func.func @transform_0(%arg0: i32, %arg1: i32) -> (i32, i32) {
    %c0_i32 = arith.constant 0 : i32
    %c0_i32_0 = arith.constant 0 : i32
    return %arg0, %c0_i32 : i32, i32
  }
  func.func @transform_1(%arg0: i32, %arg1: i32) -> (i32, i32) {
    %c0_i32 = arith.constant 0 : i32
    %c0_i32_0 = arith.constant 0 : i32
    return %arg0, %c0_i32 : i32, i32
  }
  func.func @transform_2(%arg0: i32, %arg1: i32) -> (i32, i32) {
    %c0_i32 = arith.constant 0 : i32
    %c0_i32_0 = arith.constant 0 : i32
    return %c0_i32, %arg1 : i32, i32
  }
  func.func @transform_3(%arg0: i32, %arg1: i32) -> (i32, i32) {
    %c0_i32 = arith.constant 0 : i32
    %c0_i32_0 = arith.constant 0 : i32
    return %c0_i32, %arg1 : i32, i32
  }
  func.func @transform_4(%arg0: i32, %arg1: i32) -> (i32, i32) {
    %c0_i32 = arith.constant 0 : i32
    %c0_i32_0 = arith.constant 0 : i32
    return %c0_i32, %arg1 : i32, i32
  }
  func.func @transform_5(%arg0: i32, %arg1: i32) -> (i32, i32) {
    %c0_i32 = arith.constant 0 : i32
    return %arg0, %arg1 : i32, i32
  }
}

</mosaic_0001>

<bundles_post_ra>
// kernel: _encoder_call.1
= control target key start
LH: loop header
LB: loop body
LE: loop exit
PB: predicated region body
PF: predicated region fallthrough
CT: control target
= control target key end

     0   :  { %10 = vsyncpa [#allocation4], 0  ;;  %s3399_s0 = inlined_call_operand.vmem [shape: f32[16,512], index: 0, kind: input, shape index: {}]   ;;  %s3400_s1 = inlined_call_operand.vmem [shape: f32[16,2], index: 1, kind: input, shape index: {}]   ;;  %s3401_s2 = inlined_call_operand.vmem [shape: bf16[512,1568], index: 2, kind: input, shape index: {}]   ;;  %s3402_s3 = inlined_call_operand.vmem [shape: f32[2,1568], index: 3, kind: input, shape index: {}]   ;;  %s3403_s4 = inlined_call_operand.vmem [shape: f32[1,1568], index: 4, kind: input, shape index: {}]   ;;  %s3404_s5 = inlined_call_operand.hbm [shape: f32[16,1568], index: 5, kind: output, shape index: {}]  }
   0x1   :  { %12 = vsyncpa [#allocation4 + $0x1], 0  ;;  %s2261_s18 = smov 0   ;;  %s2263_s19 = smov 0  }
   0x2   :  { %s2265_s20 = smov 0   ;;  %s2267_s21 = smov 0  }
   0x3   :  { %s2269_s22 = smov 0   ;;  %s2271_s23 = smov 0  }
   0x4 LB: > { %s1745_s24 = sadd.s32 4294967295, %s2190_s23   ;;  %s1746_s25 = sadd.s32 4294967294, %s2190_s23   ;;  %s2190_s23 = sphi %s2271_s23, %s18_s23   ;;  %s2186_s22 = sphi %s2269_s22, %s3421_s22   ;;  %s2182_s21 = sphi %s2267_s21, %s3420_s21   ;;  %s2178_s20 = sphi %s2265_s20, %s3419_s20   ;;  %s2174_s19 = sphi %s2263_s19, %s3418_s19   ;;  %s2170_s18 = sphi %s2261_s18, %s3417_s18  }
   0x5   : > { %s27_s26 = sadd.s32 1, %s2186_s22  ;;  %s89_s27 = sadd.s32 1, %s2178_s20 }
   0x6   : > { %p28_p0 = scmp.ge.s32.totalorder %s27_s26, 7  ;;  %p96_p1 = scmp.ne.s32.totalorder %s2178_s20, %s2174_s19 }
   0x7   : > { %p97_p2 = scmp.eq.s32.totalorder %s2190_s23, 0  ;;  %p180_p3 = scmp.eq.s32.totalorder %s1745_s24, 6 }
   0x8   : > { %s3423_s26 = smov (%p28_p0, %s27_s26), 0  ;;  %p185_p6 = scmp.ne.s32.totalorder %s2174_s19, %s2170_s18 }
   0x9   : > { %p98_p4 = por %p97_p2, %p96_p1  ;;  %p2300_p5 = por %p180_p3, %p96_p1 }
   0xa   : > { %s86_s29 = ssub.s32 %s2186_s22, %s3423_s26  ;;  %p186_p8 = scmp.eq.s32.totalorder %s1746_s25, 6 }
   0xb   : > { %p87_p7 = scmp.eq.s32.totalorder %s86_s29, 0  ;;  %p1750_p10 = scmp.ge.s32.totalorder %s2190_s23, 7 }
   0xc   : > { %p2311_p9 = por %p186_p8, %p185_p6 }
   0xd   : > { %s2309_s30 = scalar_select %p87_p7, %s2178_s20, %s89_s27  }
   0xe   : > { %221 = sbr.rel (%p1750_p10) target bundleno = 273 (0x111), region = 24 }
  0x15   : > { %224 = sbr.rel (!%p98_p4) target bundleno = 273 (0x111), region = 28  ;;  %s226_s7 = sand.u32 (%p98_p4), 1, %s2178_s20  }
  0x16   : > { %s1752_s8 = sshll.u32 (%p98_p4), %s2186_s22, 1  ;;  %s1751_s9 = sshll.u32 (%p98_p4), %s226_s7, 9 }
  0x17   : > { %s230_s10 = ssub.s32 (%p98_p4), 13, %s1752_s8  ;;  %s1846_s11 = sshll.u32 (%p98_p4), %s2186_s22, 3 }
  0x18   : > { %p231_p11 = scmp.lt.s32.totalorder (%p98_p4), %s230_s10, 2  ;;  %s2322_s14 = scalar_lea.vmem (%p98_p4), %s3401_s2, %s1846_s11  }
  0x19   : > { %s2326_s17 = scalar_lea.vmem (%p98_p4), [#allocation2], %s1751_s9  }
  0x1c   : > { %s3425_s10 = smov (!%p231_p11, %s230_s10), 2 }
  0x1d   : > { %s1753_s15 = sshll.u32 %s3425_s10, 12  ;;  %s2324_s16 = sshll.u32 %s3425_s10, 2 }
  0x1e   : > { %p1757_p12 = scmp.eq.s32.totalorder %s1753_s15, 0 }
  0x1f   : > { %p241_p13 = scmp.lt.u32.totalorder (!%p1757_p12), %s2324_s16, 8 }
  0x20   : > { %240 = sbr.rel (%p1757_p12) target bundleno = 273 (0x111), region = 32 }
  0x27   : > { %244 = sbr.rel (%p241_p13) target bundleno = 206 (0xce), region = 36  ;;  %s2330_s24 = sand.u32 (!%p241_p13), 7, %s2324_s16  }
  0x28   : > { %p386_p0 = scmp.eq.s32.totalorder (!%p241_p13), %s2330_s24, 0  ;;  %p1758_p1 = scmp.ne.s32.totalorder (!%p241_p13), %s2330_s24, 0 }
  0x2e   : > { %389 = sbr.rel (%p1758_p1) target bundleno = 93 (0x5d), region = 51  ;;  %s2335_s25 = sshrl.u32 (!%p1758_p1), %s2324_s16, 3 }
  0x2f   : > { %p1759_p2 = scmp.le.s32.totalorder (!%p1758_p1), %s2335_s25, 0 }
  0x35   : > { %1663 = sbr.rel (%p1759_p2) target bundleno = 93 (0x5d), region = 148  ;;  %s3407_s27 = smov (!%p1759_p2), %s2326_s17 }
  0x36   : > { %s3408_s29 = smov (!%p1759_p2), %s2322_s14  ;;  %s2344_s7 = smov (!%p1759_p2), 0  }
  0x37   : > { %s2346_s8 = smov (!%p1759_p2), 0  }
  0x3c LB: >> { %v402_v0 = vld [vmem:[%s2198_s29] sm:$0xff]  ;;  %v404_v1 = vld [vmem:[%s2198_s29 + $0x34] sm:$0xff]  ;;  %v406_v2 = vld [vmem:[%s2198_s29 + $0x68] sm:$0xff]  ;;  %s530_s9 = sadd.s32 1, %s2202_s7  ;;  %s396_s8 = sadd.s32 1, %s2206_s8   ;;  %s2206_s8 = sphi %s2346_s8, %s396_s8   ;;  %s2202_s7 = sphi %s2344_s7, %s3411_s7   ;;  %s2198_s29 = sphi %s3408_s29, %s3410_s29   ;;  %s2194_s27 = sphi %s3407_s27, %s3409_s27  }
  0x3d   : >> { %403 = vst [vmem:[%s2194_s27] sm:$0xff] %v402_v0  ;;  %405 = vst [vmem:[%s2194_s27 + $0x8] sm:$0xff] %v404_v1  ;;  %v408_v3 = vld [vmem:[%s2198_s29 + $0x9c] sm:$0xff]  ;;  %v410_v4 = vld [vmem:[%s2198_s29 + $0xd0] sm:$0xff]  ;;  %p531_p3 = scmp.ge.s32.totalorder %s530_s9, %s2335_s25  ;;  %p395_p4 = scmp.ge.s32.totalorder %s396_s8, %s2335_s25 }
  0x3e   : >> { %407 = vst [vmem:[%s2194_s27 + $0x10] sm:$0xff] %v406_v2  ;;  %v412_v5 = vld [vmem:[%s2198_s29 + $0x104] sm:$0xff]  ;;  %409 = vst [vmem:[%s2194_s27 + $0x18] sm:$0xff] %v408_v3  ;;  %v414_v6 = vld [vmem:[%s2198_s29 + $0x138] sm:$0xff] }
  0x3f   : >> { %411 = vst [vmem:[%s2194_s27 + $0x20] sm:$0xff] %v410_v4  ;;  %413 = vst [vmem:[%s2194_s27 + $0x28] sm:$0xff] %v412_v5  ;;  %v416_v7 = vld [vmem:[%s2198_s29 + $0x16c] sm:$0xff]  ;;  %v418_v8 = vld [vmem:[%s2198_s29 + $0x1a0] sm:$0xff]  ;;  %s3427_s9 = smov (%p531_p3, %s530_s9), 0 }
  0x40   : >> { %415 = vst [vmem:[%s2194_s27 + $0x30] sm:$0xff] %v414_v6  ;;  %417 = vst [vmem:[%s2194_s27 + $0x38] sm:$0xff] %v416_v7  ;;  %v420_v9 = vld [vmem:[%s2198_s29 + $0x1d4] sm:$0xff]  ;;  %v422_v10 = vld [vmem:[%s2198_s29 + $0x208] sm:$0xff]  ;;  %s1760_s10 = sshll.u32 %s3427_s9, 3  ;;  %s3411_s7 = smov %s3427_s9 }
  0x41   : >> { %419 = vst [vmem:[%s2194_s27 + $0x40] sm:$0xff] %v418_v8  ;;  %v424_v11 = vld [vmem:[%s2198_s29 + $0x23c] sm:$0xff]  ;;  %421 = vst [vmem:[%s2194_s27 + $0x48] sm:$0xff] %v420_v9  ;;  %v426_v12 = vld [vmem:[%s2198_s29 + $0x270] sm:$0xff]  ;;  %s2402_s11 = scalar_lea.vmem %s2322_s14, %s1760_s10   ;;  %s2405_s12 = scalar_lea.vmem %s2326_s17, %s1760_s10 [#allocation2]  }
  0x42   : >> { %423 = vst [vmem:[%s2194_s27 + $0x50] sm:$0xff] %v422_v10  ;;  %425 = vst [vmem:[%s2194_s27 + $0x58] sm:$0xff] %v424_v11  ;;  %v428_v13 = vld [vmem:[%s2198_s29 + $0x2a4] sm:$0xff]  ;;  %v430_v14 = vld [vmem:[%s2198_s29 + $0x2d8] sm:$0xff] }
  0x43   : >> { %427 = vst [vmem:[%s2194_s27 + $0x60] sm:$0xff] %v426_v12  ;;  %429 = vst [vmem:[%s2194_s27 + $0x68] sm:$0xff] %v428_v13  ;;  %v432_v15 = vld [vmem:[%s2198_s29 + $0x30c] sm:$0xff]  ;;  %v434_v16 = vld [vmem:[%s2198_s29 + $0x340] sm:$0xff] }
  0x44   : >> { %431 = vst [vmem:[%s2194_s27 + $0x70] sm:$0xff] %v430_v14  ;;  %v436_v17 = vld [vmem:[%s2198_s29 + $0x374] sm:$0xff]  ;;  %433 = vst [vmem:[%s2194_s27 + $0x78] sm:$0xff] %v432_v15  ;;  %v438_v18 = vld [vmem:[%s2198_s29 + $0x3a8] sm:$0xff] }
  0x45   : >> { %435 = vst [vmem:[%s2194_s27 + $0x80] sm:$0xff] %v434_v16  ;;  %437 = vst [vmem:[%s2194_s27 + $0x88] sm:$0xff] %v436_v17  ;;  %v440_v19 = vld [vmem:[%s2198_s29 + $0x3dc] sm:$0xff]  ;;  %v442_v20 = vld [vmem:[%s2198_s29 + $0x410] sm:$0xff] }
  0x46   : >> { %439 = vst [vmem:[%s2194_s27 + $0x90] sm:$0xff] %v438_v18  ;;  %441 = vst [vmem:[%s2194_s27 + $0x98] sm:$0xff] %v440_v19  ;;  %v444_v21 = vld [vmem:[%s2198_s29 + $0x444] sm:$0xff]  ;;  %v446_v22 = vld [vmem:[%s2198_s29 + $0x478] sm:$0xff] }
  0x47   : >> { %443 = vst [vmem:[%s2194_s27 + $0xa0] sm:$0xff] %v442_v20  ;;  %v448_v23 = vld [vmem:[%s2198_s29 + $0x4ac] sm:$0xff]  ;;  %445 = vst [vmem:[%s2194_s27 + $0xa8] sm:$0xff] %v444_v21  ;;  %v450_v24 = vld [vmem:[%s2198_s29 + $0x4e0] sm:$0xff] }
  0x48   : >> { %447 = vst [vmem:[%s2194_s27 + $0xb0] sm:$0xff] %v446_v22  ;;  %449 = vst [vmem:[%s2194_s27 + $0xb8] sm:$0xff] %v448_v23  ;;  %v452_v25 = vld [vmem:[%s2198_s29 + $0x514] sm:$0xff]  ;;  %v454_v26 = vld [vmem:[%s2198_s29 + $0x548] sm:$0xff] }
  0x49   : >> { %451 = vst [vmem:[%s2194_s27 + $0xc0] sm:$0xff] %v450_v24  ;;  %453 = vst [vmem:[%s2194_s27 + $0xc8] sm:$0xff] %v452_v25  ;;  %v456_v27 = vld [vmem:[%s2198_s29 + $0x57c] sm:$0xff]  ;;  %v458_v28 = vld [vmem:[%s2198_s29 + $0x5b0] sm:$0xff] }
  0x4a   : >> { %455 = vst [vmem:[%s2194_s27 + $0xd0] sm:$0xff] %v454_v26  ;;  %v460_v29 = vld [vmem:[%s2198_s29 + $0x5e4] sm:$0xff]  ;;  %457 = vst [vmem:[%s2194_s27 + $0xd8] sm:$0xff] %v456_v27  ;;  %v462_v30 = vld [vmem:[%s2198_s29 + $0x618] sm:$0xff] }
  0x4b   : >> { %459 = vst [vmem:[%s2194_s27 + $0xe0] sm:$0xff] %v458_v28  ;;  %461 = vst [vmem:[%s2194_s27 + $0xe8] sm:$0xff] %v460_v29  ;;  %v464_v31 = vld [vmem:[%s2198_s29 + $0x64c] sm:$0xff]  ;;  %v466_v32 = vld [vmem:[%s2198_s29 + $0x680] sm:$0xff] }
  0x4c   : >> { %463 = vst [vmem:[%s2194_s27 + $0xf0] sm:$0xff] %v462_v30  ;;  %465 = vst [vmem:[%s2194_s27 + $0xf8] sm:$0xff] %v464_v31  ;;  %v468_v33 = vld [vmem:[%s2198_s29 + $0x6b4] sm:$0xff]  ;;  %v470_v34 = vld [vmem:[%s2198_s29 + $0x6e8] sm:$0xff] }
  0x4d   : >> { %467 = vst [vmem:[%s2194_s27 + $0x100] sm:$0xff] %v466_v32  ;;  %v472_v35 = vld [vmem:[%s2198_s29 + $0x71c] sm:$0xff]  ;;  %469 = vst [vmem:[%s2194_s27 + $0x108] sm:$0xff] %v468_v33  ;;  %v474_v36 = vld [vmem:[%s2198_s29 + $0x750] sm:$0xff] }
  0x4e   : >> { %471 = vst [vmem:[%s2194_s27 + $0x110] sm:$0xff] %v470_v34  ;;  %473 = vst [vmem:[%s2194_s27 + $0x118] sm:$0xff] %v472_v35  ;;  %v476_v37 = vld [vmem:[%s2198_s29 + $0x784] sm:$0xff]  ;;  %v478_v38 = vld [vmem:[%s2198_s29 + $0x7b8] sm:$0xff] }
  0x4f   : >> { %475 = vst [vmem:[%s2194_s27 + $0x120] sm:$0xff] %v474_v36  ;;  %477 = vst [vmem:[%s2194_s27 + $0x128] sm:$0xff] %v476_v37  ;;  %v480_v39 = vld [vmem:[%s2198_s29 + $0x7ec] sm:$0xff]  ;;  %v482_v40 = vld [vmem:[%s2198_s29 + $0x820] sm:$0xff] }
  0x50   : >> { %479 = vst [vmem:[%s2194_s27 + $0x130] sm:$0xff] %v478_v38  ;;  %v484_v41 = vld [vmem:[%s2198_s29 + $0x854] sm:$0xff]  ;;  %481 = vst [vmem:[%s2194_s27 + $0x138] sm:$0xff] %v480_v39  ;;  %v486_v42 = vld [vmem:[%s2198_s29 + $0x888] sm:$0xff] }
  0x51   : >> { %483 = vst [vmem:[%s2194_s27 + $0x140] sm:$0xff] %v482_v40  ;;  %485 = vst [vmem:[%s2194_s27 + $0x148] sm:$0xff] %v484_v41  ;;  %v488_v43 = vld [vmem:[%s2198_s29 + $0x8bc] sm:$0xff]  ;;  %v490_v44 = vld [vmem:[%s2198_s29 + $0x8f0] sm:$0xff] }
  0x52   : >> { %487 = vst [vmem:[%s2194_s27 + $0x150] sm:$0xff] %v486_v42  ;;  %489 = vst [vmem:[%s2194_s27 + $0x158] sm:$0xff] %v488_v43  ;;  %v492_v45 = vld [vmem:[%s2198_s29 + $0x924] sm:$0xff]  ;;  %v494_v46 = vld [vmem:[%s2198_s29 + $0x958] sm:$0xff] }
  0x53   : >> { %491 = vst [vmem:[%s2194_s27 + $0x160] sm:$0xff] %v490_v44  ;;  %v496_v47 = vld [vmem:[%s2198_s29 + $0x98c] sm:$0xff]  ;;  %493 = vst [vmem:[%s2194_s27 + $0x168] sm:$0xff] %v492_v45  ;;  %v498_v48 = vld [vmem:[%s2198_s29 + $0x9c0] sm:$0xff] }
  0x54   : >> { %495 = vst [vmem:[%s2194_s27 + $0x170] sm:$0xff] %v494_v46  ;;  %497 = vst [vmem:[%s2194_s27 + $0x178] sm:$0xff] %v496_v47  ;;  %v500_v49 = vld [vmem:[%s2198_s29 + $0x9f4] sm:$0xff]  ;;  %v502_v50 = vld [vmem:[%s2198_s29 + $0xa28] sm:$0xff] }
  0x55   : >> { %499 = vst [vmem:[%s2194_s27 + $0x180] sm:$0xff] %v498_v48  ;;  %501 = vst [vmem:[%s2194_s27 + $0x188] sm:$0xff] %v500_v49  ;;  %v504_v51 = vld [vmem:[%s2198_s29 + $0xa5c] sm:$0xff]  ;;  %v506_v52 = vld [vmem:[%s2198_s29 + $0xa90] sm:$0xff] }
  0x56   : >> { %503 = vst [vmem:[%s2194_s27 + $0x190] sm:$0xff] %v502_v50  ;;  %v508_v53 = vld [vmem:[%s2198_s29 + $0xac4] sm:$0xff]  ;;  %505 = vst [vmem:[%s2194_s27 + $0x198] sm:$0xff] %v504_v51  ;;  %v510_v54 = vld [vmem:[%s2198_s29 + $0xaf8] sm:$0xff]  ;;  %398 = sbr.rel (!%p395_p4) target bundleno = 60 (0x3c), region = 154 }
  0x57   : >> { %507 = vst [vmem:[%s2194_s27 + $0x1a0] sm:$0xff] %v506_v52  ;;  %509 = vst [vmem:[%s2194_s27 + $0x1a8] sm:$0xff] %v508_v53  ;;  %v512_v55 = vld [vmem:[%s2198_s29 + $0xb2c] sm:$0xff]  ;;  %v514_v56 = vld [vmem:[%s2198_s29 + $0xb60] sm:$0xff] }
  0x58   : >> { %511 = vst [vmem:[%s2194_s27 + $0x1b0] sm:$0xff] %v510_v54  ;;  %513 = vst [vmem:[%s2194_s27 + $0x1b8] sm:$0xff] %v512_v55  ;;  %v516_v57 = vld [vmem:[%s2198_s29 + $0xb94] sm:$0xff]  ;;  %v518_v58 = vld [vmem:[%s2198_s29 + $0xbc8] sm:$0xff] }
  0x59   : >> { %515 = vst [vmem:[%s2194_s27 + $0x1c0] sm:$0xff] %v514_v56  ;;  %v520_v59 = vld [vmem:[%s2198_s29 + $0xbfc] sm:$0xff]  ;;  %517 = vst [vmem:[%s2194_s27 + $0x1c8] sm:$0xff] %v516_v57  ;;  %v522_v60 = vld [vmem:[%s2198_s29 + $0xc30] sm:$0xff] }
  0x5a   : >> { %519 = vst [vmem:[%s2194_s27 + $0x1d0] sm:$0xff] %v518_v58  ;;  %521 = vst [vmem:[%s2194_s27 + $0x1d8] sm:$0xff] %v520_v59  ;;  %v524_v61 = vld [vmem:[%s2198_s29 + $0xc64] sm:$0xff]  ;;  %v526_v62 = vld [vmem:[%s2198_s29 + $0xc98] sm:$0xff] }
  0x5b   : >> { %523 = vst [vmem:[%s2194_s27 + $0x1e0] sm:$0xff] %v522_v60  ;;  %525 = vst [vmem:[%s2194_s27 + $0x1e8] sm:$0xff] %v524_v61  ;;  %v528_v63 = vld [vmem:[%s2198_s29 + $0xccc] sm:$0xff]  ;;  %s3410_s29 = smov %s2402_s11 }
  0x5c   : >> { %527 = vst [vmem:[%s2194_s27 + $0x1f0] sm:$0xff] %v526_v62  ;;  %529 = vst [vmem:[%s2194_s27 + $0x1f8] sm:$0xff] %v528_v63  ;;  %s3409_s27 = smov %s2405_s12 }
  0x5d PF: > { %539 = sbr.rel (%p386_p0) target bundleno = 206 (0xce), region = 62  ;;  %s541_s13 = ssub.s32 (!%p386_p0), %s2324_s16, %s2330_s24 }
  0x5e   : > { %s2514_s15 = sshrl.u32 (!%p386_p0), %s2324_s16, 3  ;;  %s2517_s10 = scalar_lea.vmem (!%p386_p0), %s2322_s14, %s541_s13 }
  0x5f   : > { %s2520_s11 = scalar_lea.vmem (!%p386_p0), %s2326_s17, %s541_s13 [#allocation2]  ;;  %p1762_p6 = scmp.le.s32.totalorder (!%p386_p0), %s2514_s15, 0 }
  0x64   : > { %1677 = sbr.rel (%p1762_p6) target bundleno = 140 (0x8c), region = 159  ;;  %s3412_s25 = smov (!%p1762_p6), %s2326_s17 }
  0x65   : > { %s3413_s27 = smov (!%p1762_p6), %s2322_s14  ;;  %s2529_s29 = smov (!%p1762_p6), 0  }
  0x66   : > { %s2531_s7 = smov (!%p1762_p6), 0  }
  0x6b LB: >> { %v557_v0 = vld [vmem:[%s2214_s27] sm:$0xff]  ;;  %v559_v1 = vld [vmem:[%s2214_s27 + $0x34] sm:$0xff]  ;;  %v561_v2 = vld [vmem:[%s2214_s27 + $0x68] sm:$0xff]  ;;  %s685_s8 = sadd.s32 1, %s2218_s29  ;;  %s551_s7 = sadd.s32 1, %s2222_s7   ;;  %s2222_s7 = sphi %s2531_s7, %s551_s7   ;;  %s2218_s29 = sphi %s2529_s29, %s3416_s29   ;;  %s2214_s27 = sphi %s3413_s27, %s3415_s27   ;;  %s2210_s25 = sphi %s3412_s25, %s3414_s25  }
  0x6c   : >> { %558 = vst [vmem:[%s2210_s25] sm:$0xff] %v557_v0  ;;  %560 = vst [vmem:[%s2210_s25 + $0x8] sm:$0xff] %v559_v1  ;;  %v563_v3 = vld [vmem:[%s2214_s27 + $0x9c] sm:$0xff]  ;;  %v565_v4 = vld [vmem:[%s2214_s27 + $0xd0] sm:$0xff]  ;;  %p686_p7 = scmp.ge.s32.totalorder %s685_s8, %s2514_s15  ;;  %p550_p8 = scmp.ge.s32.totalorder %s551_s7, %s2514_s15 }
  0x6d   : >> { %562 = vst [vmem:[%s2210_s25 + $0x10] sm:$0xff] %v561_v2  ;;  %v567_v5 = vld [vmem:[%s2214_s27 + $0x104] sm:$0xff]  ;;  %564 = vst [vmem:[%s2210_s25 + $0x18] sm:$0xff] %v563_v3  ;;  %v569_v6 = vld [vmem:[%s2214_s27 + $0x138] sm:$0xff] }
  0x6e   : >> { %566 = vst [vmem:[%s2210_s25 + $0x20] sm:$0xff] %v565_v4  ;;  %568 = vst [vmem:[%s2210_s25 + $0x28] sm:$0xff] %v567_v5  ;;  %v571_v7 = vld [vmem:[%s2214_s27 + $0x16c] sm:$0xff]  ;;  %v573_v8 = vld [vmem:[%s2214_s27 + $0x1a0] sm:$0xff]  ;;  %s3429_s8 = smov (%p686_p7, %s685_s8), 0 }
  0x6f   : >> { %570 = vst [vmem:[%s2210_s25 + $0x30] sm:$0xff] %v569_v6  ;;  %572 = vst [vmem:[%s2210_s25 + $0x38] sm:$0xff] %v571_v7  ;;  %v575_v9 = vld [vmem:[%s2214_s27 + $0x1d4] sm:$0xff]  ;;  %v577_v10 = vld [vmem:[%s2214_s27 + $0x208] sm:$0xff]  ;;  %s1763_s9 = sshll.u32 %s3429_s8, 3  ;;  %s3416_s29 = smov %s3429_s8 }
  0x70   : >> { %574 = vst [vmem:[%s2210_s25 + $0x40] sm:$0xff] %v573_v8  ;;  %v579_v11 = vld [vmem:[%s2214_s27 + $0x23c] sm:$0xff]  ;;  %576 = vst [vmem:[%s2210_s25 + $0x48] sm:$0xff] %v575_v9  ;;  %v581_v12 = vld [vmem:[%s2214_s27 + $0x270] sm:$0xff]  ;;  %s2587_s12 = scalar_lea.vmem %s2322_s14, %s1763_s9   ;;  %s2590_s13 = scalar_lea.vmem %s2326_s17, %s1763_s9 [#allocation2]  }
  0x71   : >> { %578 = vst [vmem:[%s2210_s25 + $0x50] sm:$0xff] %v577_v10  ;;  %580 = vst [vmem:[%s2210_s25 + $0x58] sm:$0xff] %v579_v11  ;;  %v583_v13 = vld [vmem:[%s2214_s27 + $0x2a4] sm:$0xff]  ;;  %v585_v14 = vld [vmem:[%s2214_s27 + $0x2d8] sm:$0xff] }
  0x72   : >> { %582 = vst [vmem:[%s2210_s25 + $0x60] sm:$0xff] %v581_v12  ;;  %584 = vst [vmem:[%s2210_s25 + $0x68] sm:$0xff] %v583_v13  ;;  %v587_v15 = vld [vmem:[%s2214_s27 + $0x30c] sm:$0xff]  ;;  %v589_v16 = vld [vmem:[%s2214_s27 + $0x340] sm:$0xff] }
  0x73   : >> { %586 = vst [vmem:[%s2210_s25 + $0x70] sm:$0xff] %v585_v14  ;;  %v591_v17 = vld [vmem:[%s2214_s27 + $0x374] sm:$0xff]  ;;  %588 = vst [vmem:[%s2210_s25 + $0x78] sm:$0xff] %v587_v15  ;;  %v593_v18 = vld [vmem:[%s2214_s27 + $0x3a8] sm:$0xff] }
  0x74   : >> { %590 = vst [vmem:[%s2210_s25 + $0x80] sm:$0xff] %v589_v16  ;;  %592 = vst [vmem:[%s2210_s25 + $0x88] sm:$0xff] %v591_v17  ;;  %v595_v19 = vld [vmem:[%s2214_s27 + $0x3dc] sm:$0xff]  ;;  %v597_v20 = vld [vmem:[%s2214_s27 + $0x410] sm:$0xff] }
  0x75   : >> { %594 = vst [vmem:[%s2210_s25 + $0x90] sm:$0xff] %v593_v18  ;;  %596 = vst [vmem:[%s2210_s25 + $0x98] sm:$0xff] %v595_v19  ;;  %v599_v21 = vld [vmem:[%s2214_s27 + $0x444] sm:$0xff]  ;;  %v601_v22 = vld [vmem:[%s2214_s27 + $0x478] sm:$0xff] }
  0x76   : >> { %598 = vst [vmem:[%s2210_s25 + $0xa0] sm:$0xff] %v597_v20  ;;  %v603_v23 = vld [vmem:[%s2214_s27 + $0x4ac] sm:$0xff]  ;;  %600 = vst [vmem:[%s2210_s25 + $0xa8] sm:$0xff] %v599_v21  ;;  %v605_v24 = vld [vmem:[%s2214_s27 + $0x4e0] sm:$0xff] }
  0x77   : >> { %602 = vst [vmem:[%s2210_s25 + $0xb0] sm:$0xff] %v601_v22  ;;  %604 = vst [vmem:[%s2210_s25 + $0xb8] sm:$0xff] %v603_v23  ;;  %v607_v25 = vld [vmem:[%s2214_s27 + $0x514] sm:$0xff]  ;;  %v609_v26 = vld [vmem:[%s2214_s27 + $0x548] sm:$0xff] }
  0x78   : >> { %606 = vst [vmem:[%s2210_s25 + $0xc0] sm:$0xff] %v605_v24  ;;  %608 = vst [vmem:[%s2210_s25 + $0xc8] sm:$0xff] %v607_v25  ;;  %v611_v27 = vld [vmem:[%s2214_s27 + $0x57c] sm:$0xff]  ;;  %v613_v28 = vld [vmem:[%s2214_s27 + $0x5b0] sm:$0xff] }
  0x79   : >> { %610 = vst [vmem:[%s2210_s25 + $0xd0] sm:$0xff] %v609_v26  ;;  %v615_v29 = vld [vmem:[%s2214_s27 + $0x5e4] sm:$0xff]  ;;  %612 = vst [vmem:[%s2210_s25 + $0xd8] sm:$0xff] %v611_v27  ;;  %v617_v30 = vld [vmem:[%s2214_s27 + $0x618] sm:$0xff] }
  0x7a   : >> { %614 = vst [vmem:[%s2210_s25 + $0xe0] sm:$0xff] %v613_v28  ;;  %616 = vst [vmem:[%s2210_s25 + $0xe8] sm:$0xff] %v615_v29  ;;  %v619_v31 = vld [vmem:[%s2214_s27 + $0x64c] sm:$0xff]  ;;  %v621_v32 = vld [vmem:[%s2214_s27 + $0x680] sm:$0xff] }
  0x7b   : >> { %618 = vst [vmem:[%s2210_s25 + $0xf0] sm:$0xff] %v617_v30  ;;  %620 = vst [vmem:[%s2210_s25 + $0xf8] sm:$0xff] %v619_v31  ;;  %v623_v33 = vld [vmem:[%s2214_s27 + $0x6b4] sm:$0xff]  ;;  %v625_v34 = vld [vmem:[%s2214_s27 + $0x6e8] sm:$0xff] }
  0x7c   : >> { %622 = vst [vmem:[%s2210_s25 + $0x100] sm:$0xff] %v621_v32  ;;  %v627_v35 = vld [vmem:[%s2214_s27 + $0x71c] sm:$0xff]  ;;  %624 = vst [vmem:[%s2210_s25 + $0x108] sm:$0xff] %v623_v33  ;;  %v629_v36 = vld [vmem:[%s2214_s27 + $0x750] sm:$0xff] }
  0x7d   : >> { %626 = vst [vmem:[%s2210_s25 + $0x110] sm:$0xff] %v625_v34  ;;  %628 = vst [vmem:[%s2210_s25 + $0x118] sm:$0xff] %v627_v35  ;;  %v631_v37 = vld [vmem:[%s2214_s27 + $0x784] sm:$0xff]  ;;  %v633_v38 = vld [vmem:[%s2214_s27 + $0x7b8] sm:$0xff] }
  0x7e   : >> { %630 = vst [vmem:[%s2210_s25 + $0x120] sm:$0xff] %v629_v36  ;;  %632 = vst [vmem:[%s2210_s25 + $0x128] sm:$0xff] %v631_v37  ;;  %v635_v39 = vld [vmem:[%s2214_s27 + $0x7ec] sm:$0xff]  ;;  %v637_v40 = vld [vmem:[%s2214_s27 + $0x820] sm:$0xff] }
  0x7f   : >> { %634 = vst [vmem:[%s2210_s25 + $0x130] sm:$0xff] %v633_v38  ;;  %v639_v41 = vld [vmem:[%s2214_s27 + $0x854] sm:$0xff]  ;;  %636 = vst [vmem:[%s2210_s25 + $0x138] sm:$0xff] %v635_v39  ;;  %v641_v42 = vld [vmem:[%s2214_s27 + $0x888] sm:$0xff] }
  0x80   : >> { %638 = vst [vmem:[%s2210_s25 + $0x140] sm:$0xff] %v637_v40  ;;  %640 = vst [vmem:[%s2210_s25 + $0x148] sm:$0xff] %v639_v41  ;;  %v643_v43 = vld [vmem:[%s2214_s27 + $0x8bc] sm:$0xff]  ;;  %v645_v44 = vld [vmem:[%s2214_s27 + $0x8f0] sm:$0xff] }
  0x81   : >> { %642 = vst [vmem:[%s2210_s25 + $0x150] sm:$0xff] %v641_v42  ;;  %644 = vst [vmem:[%s2210_s25 + $0x158] sm:$0xff] %v643_v43  ;;  %v647_v45 = vld [vmem:[%s2214_s27 + $0x924] sm:$0xff]  ;;  %v649_v46 = vld [vmem:[%s2214_s27 + $0x958] sm:$0xff] }
  0x82   : >> { %646 = vst [vmem:[%s2210_s25 + $0x160] sm:$0xff] %v645_v44  ;;  %v651_v47 = vld [vmem:[%s2214_s27 + $0x98c] sm:$0xff]  ;;  %648 = vst [vmem:[%s2210_s25 + $0x168] sm:$0xff] %v647_v45  ;;  %v653_v48 = vld [vmem:[%s2214_s27 + $0x9c0] sm:$0xff] }
  0x83   : >> { %650 = vst [vmem:[%s2210_s25 + $0x170] sm:$0xff] %v649_v46  ;;  %652 = vst [vmem:[%s2210_s25 + $0x178] sm:$0xff] %v651_v47  ;;  %v655_v49 = vld [vmem:[%s2214_s27 + $0x9f4] sm:$0xff]  ;;  %v657_v50 = vld [vmem:[%s2214_s27 + $0xa28] sm:$0xff] }
  0x84   : >> { %654 = vst [vmem:[%s2210_s25 + $0x180] sm:$0xff] %v653_v48  ;;  %656 = vst [vmem:[%s2210_s25 + $0x188] sm:$0xff] %v655_v49  ;;  %v659_v51 = vld [vmem:[%s2214_s27 + $0xa5c] sm:$0xff]  ;;  %v661_v52 = vld [vmem:[%s2214_s27 + $0xa90] sm:$0xff] }
  0x85   : >> { %658 = vst [vmem:[%s2210_s25 + $0x190] sm:$0xff] %v657_v50  ;;  %v663_v53 = vld [vmem:[%s2214_s27 + $0xac4] sm:$0xff]  ;;  %660 = vst [vmem:[%s2210_s25 + $0x198] sm:$0xff] %v659_v51  ;;  %v665_v54 = vld [vmem:[%s2214_s27 + $0xaf8] sm:$0xff]  ;;  %553 = sbr.rel (!%p550_p8) target bundleno = 107 (0x6b), region = 165 }
  0x86   : >> { %662 = vst [vmem:[%s2210_s25 + $0x1a0] sm:$0xff] %v661_v52  ;;  %664 = vst [vmem:[%s2210_s25 + $0x1a8] sm:$0xff] %v663_v53  ;;  %v667_v55 = vld [vmem:[%s2214_s27 + $0xb2c] sm:$0xff]  ;;  %v669_v56 = vld [vmem:[%s2214_s27 + $0xb60] sm:$0xff] }
  0x87   : >> { %666 = vst [vmem:[%s2210_s25 + $0x1b0] sm:$0xff] %v665_v54  ;;  %668 = vst [vmem:[%s2210_s25 + $0x1b8] sm:$0xff] %v667_v55  ;;  %v671_v57 = vld [vmem:[%s2214_s27 + $0xb94] sm:$0xff]  ;;  %v673_v58 = vld [vmem:[%s2214_s27 + $0xbc8] sm:$0xff] }
  0x88   : >> { %670 = vst [vmem:[%s2210_s25 + $0x1c0] sm:$0xff] %v669_v56  ;;  %v675_v59 = vld [vmem:[%s2214_s27 + $0xbfc] sm:$0xff]  ;;  %672 = vst [vmem:[%s2210_s25 + $0x1c8] sm:$0xff] %v671_v57  ;;  %v677_v60 = vld [vmem:[%s2214_s27 + $0xc30] sm:$0xff] }
  0x89   : >> { %674 = vst [vmem:[%s2210_s25 + $0x1d0] sm:$0xff] %v673_v58  ;;  %676 = vst [vmem:[%s2210_s25 + $0x1d8] sm:$0xff] %v675_v59  ;;  %v679_v61 = vld [vmem:[%s2214_s27 + $0xc64] sm:$0xff]  ;;  %v681_v62 = vld [vmem:[%s2214_s27 + $0xc98] sm:$0xff] }
  0x8a   : >> { %678 = vst [vmem:[%s2210_s25 + $0x1e0] sm:$0xff] %v677_v60  ;;  %680 = vst [vmem:[%s2210_s25 + $0x1e8] sm:$0xff] %v679_v61  ;;  %v683_v63 = vld [vmem:[%s2214_s27 + $0xccc] sm:$0xff]  ;;  %s3415_s27 = smov %s2587_s12 }
  0x8b   : >> { %682 = vst [vmem:[%s2210_s25 + $0x1f0] sm:$0xff] %v681_v62  ;;  %684 = vst [vmem:[%s2210_s25 + $0x1f8] sm:$0xff] %v683_v63  ;;  %s3414_s25 = smov %s2590_s13 }
  0x8c PF: > { %s2224_s9 = smov 0  }
  0x8d   : > { %s2695_s8 = sshllo.u32 %s2224_s9, %s2330_s24 }
  0x8e   : > { %v701_v0 = vld [vmem:[%s2517_s10] sm:%s2695_s8]  ;;  %v703_v1 = vld [vmem:[%s2517_s10 + $0x34] sm:%s2695_s8] }
  0x8f   : > { %702 = vst [vmem:[%s2520_s11] sm:%s2695_s8] %v701_v0  ;;  %704 = vst [vmem:[%s2520_s11 + $0x8] sm:%s2695_s8] %v703_v1 }
  0x90   : > { %v705_v2 = vld [vmem:[%s2517_s10 + $0x68] sm:%s2695_s8]  ;;  %v707_v3 = vld [vmem:[%s2517_s10 + $0x9c] sm:%s2695_s8] }
  0x91   : > { %706 = vst [vmem:[%s2520_s11 + $0x10] sm:%s2695_s8] %v705_v2  ;;  %708 = vst [vmem:[%s2520_s11 + $0x18] sm:%s2695_s8] %v707_v3 }
  0x92   : > { %v709_v4 = vld [vmem:[%s2517_s10 + $0xd0] sm:%s2695_s8]  ;;  %v711_v5 = vld [vmem:[%s2517_s10 + $0x104] sm:%s2695_s8] }
  0x93   : > { %710 = vst [vmem:[%s2520_s11 + $0x20] sm:%s2695_s8] %v709_v4  ;;  %712 = vst [vmem:[%s2520_s11 + $0x28] sm:%s2695_s8] %v711_v5 }
  0x94   : > { %v713_v6 = vld [vmem:[%s2517_s10 + $0x138] sm:%s2695_s8]  ;;  %v715_v7 = vld [vmem:[%s2517_s10 + $0x16c] sm:%s2695_s8] }
  0x95   : > { %714 = vst [vmem:[%s2520_s11 + $0x30] sm:%s2695_s8] %v713_v6  ;;  %716 = vst [vmem:[%s2520_s11 + $0x38] sm:%s2695_s8] %v715_v7 }
  0x96   : > { %v717_v8 = vld [vmem:[%s2517_s10 + $0x1a0] sm:%s2695_s8]  ;;  %v719_v9 = vld [vmem:[%s2517_s10 + $0x1d4] sm:%s2695_s8] }
  0x97   : > { %718 = vst [vmem:[%s2520_s11 + $0x40] sm:%s2695_s8] %v717_v8  ;;  %720 = vst [vmem:[%s2520_s11 + $0x48] sm:%s2695_s8] %v719_v9 }
  0x98   : > { %v721_v10 = vld [vmem:[%s2517_s10 + $0x208] sm:%s2695_s8]  ;;  %v723_v11 = vld [vmem:[%s2517_s10 + $0x23c] sm:%s2695_s8] }
  0x99   : > { %722 = vst [vmem:[%s2520_s11 + $0x50] sm:%s2695_s8] %v721_v10  ;;  %724 = vst [vmem:[%s2520_s11 + $0x58] sm:%s2695_s8] %v723_v11 }
  0x9a   : > { %v725_v12 = vld [vmem:[%s2517_s10 + $0x270] sm:%s2695_s8]  ;;  %v727_v13 = vld [vmem:[%s2517_s10 + $0x2a4] sm:%s2695_s8] }
  0x9b   : > { %726 = vst [vmem:[%s2520_s11 + $0x60] sm:%s2695_s8] %v725_v12  ;;  %728 = vst [vmem:[%s2520_s11 + $0x68] sm:%s2695_s8] %v727_v13 }
  0x9c   : > { %v729_v14 = vld [vmem:[%s2517_s10 + $0x2d8] sm:%s2695_s8]  ;;  %v731_v15 = vld [vmem:[%s2517_s10 + $0x30c] sm:%s2695_s8] }
  0x9d   : > { %730 = vst [vmem:[%s2520_s11 + $0x70] sm:%s2695_s8] %v729_v14  ;;  %732 = vst [vmem:[%s2520_s11 + $0x78] sm:%s2695_s8] %v731_v15 }
  0x9e   : > { %v733_v16 = vld [vmem:[%s2517_s10 + $0x340] sm:%s2695_s8]  ;;  %v735_v17 = vld [vmem:[%s2517_s10 + $0x374] sm:%s2695_s8] }
  0x9f   : > { %734 = vst [vmem:[%s2520_s11 + $0x80] sm:%s2695_s8] %v733_v16  ;;  %736 = vst [vmem:[%s2520_s11 + $0x88] sm:%s2695_s8] %v735_v17 }
  0xa0   : > { %v737_v18 = vld [vmem:[%s2517_s10 + $0x3a8] sm:%s2695_s8]  ;;  %v739_v19 = vld [vmem:[%s2517_s10 + $0x3dc] sm:%s2695_s8] }
  0xa1   : > { %738 = vst [vmem:[%s2520_s11 + $0x90] sm:%s2695_s8] %v737_v18  ;;  %740 = vst [vmem:[%s2520_s11 + $0x98] sm:%s2695_s8] %v739_v19 }
  0xa2   : > { %v741_v20 = vld [vmem:[%s2517_s10 + $0x410] sm:%s2695_s8]  ;;  %v743_v21 = vld [vmem:[%s2517_s10 + $0x444] sm:%s2695_s8] }
  0xa3   : > { %742 = vst [vmem:[%s2520_s11 + $0xa0] sm:%s2695_s8] %v741_v20  ;;  %744 = vst [vmem:[%s2520_s11 + $0xa8] sm:%s2695_s8] %v743_v21 }
  0xa4   : > { %v745_v22 = vld [vmem:[%s2517_s10 + $0x478] sm:%s2695_s8]  ;;  %v747_v23 = vld [vmem:[%s2517_s10 + $0x4ac] sm:%s2695_s8] }
  0xa5   : > { %746 = vst [vmem:[%s2520_s11 + $0xb0] sm:%s2695_s8] %v745_v22  ;;  %748 = vst [vmem:[%s2520_s11 + $0xb8] sm:%s2695_s8] %v747_v23 }
  0xa6   : > { %v749_v24 = vld [vmem:[%s2517_s10 + $0x4e0] sm:%s2695_s8]  ;;  %v751_v25 = vld [vmem:[%s2517_s10 + $0x514] sm:%s2695_s8] }
  0xa7   : > { %750 = vst [vmem:[%s2520_s11 + $0xc0] sm:%s2695_s8] %v749_v24  ;;  %752 = vst [vmem:[%s2520_s11 + $0xc8] sm:%s2695_s8] %v751_v25 }
  0xa8   : > { %v753_v26 = vld [vmem:[%s2517_s10 + $0x548] sm:%s2695_s8]  ;;  %v755_v27 = vld [vmem:[%s2517_s10 + $0x57c] sm:%s2695_s8] }
  0xa9   : > { %754 = vst [vmem:[%s2520_s11 + $0xd0] sm:%s2695_s8] %v753_v26  ;;  %756 = vst [vmem:[%s2520_s11 + $0xd8] sm:%s2695_s8] %v755_v27 }
  0xaa   : > { %v757_v28 = vld [vmem:[%s2517_s10 + $0x5b0] sm:%s2695_s8]  ;;  %v759_v29 = vld [vmem:[%s2517_s10 + $0x5e4] sm:%s2695_s8] }
  0xab   : > { %758 = vst [vmem:[%s2520_s11 + $0xe0] sm:%s2695_s8] %v757_v28  ;;  %760 = vst [vmem:[%s2520_s11 + $0xe8] sm:%s2695_s8] %v759_v29 }
  0xac   : > { %v761_v30 = vld [vmem:[%s2517_s10 + $0x618] sm:%s2695_s8]  ;;  %v763_v31 = vld [vmem:[%s2517_s10 + $0x64c] sm:%s2695_s8] }
  0xad   : > { %762 = vst [vmem:[%s2520_s11 + $0xf0] sm:%s2695_s8] %v761_v30  ;;  %764 = vst [vmem:[%s2520_s11 + $0xf8] sm:%s2695_s8] %v763_v31 }
  0xae   : > { %v765_v32 = vld [vmem:[%s2517_s10 + $0x680] sm:%s2695_s8]  ;;  %v767_v33 = vld [vmem:[%s2517_s10 + $0x6b4] sm:%s2695_s8] }
  0xaf   : > { %766 = vst [vmem:[%s2520_s11 + $0x100] sm:%s2695_s8] %v765_v32  ;;  %768 = vst [vmem:[%s2520_s11 + $0x108] sm:%s2695_s8] %v767_v33 }
  0xb0   : > { %v769_v34 = vld [vmem:[%s2517_s10 + $0x6e8] sm:%s2695_s8]  ;;  %v771_v35 = vld [vmem:[%s2517_s10 + $0x71c] sm:%s2695_s8] }
  0xb1   : > { %770 = vst [vmem:[%s2520_s11 + $0x110] sm:%s2695_s8] %v769_v34  ;;  %772 = vst [vmem:[%s2520_s11 + $0x118] sm:%s2695_s8] %v771_v35 }
  0xb2   : > { %v773_v36 = vld [vmem:[%s2517_s10 + $0x750] sm:%s2695_s8]  ;;  %v775_v37 = vld [vmem:[%s2517_s10 + $0x784] sm:%s2695_s8] }
  0xb3   : > { %774 = vst [vmem:[%s2520_s11 + $0x120] sm:%s2695_s8] %v773_v36  ;;  %776 = vst [vmem:[%s2520_s11 + $0x128] sm:%s2695_s8] %v775_v37 }
  0xb4   : > { %v777_v38 = vld [vmem:[%s2517_s10 + $0x7b8] sm:%s2695_s8]  ;;  %v779_v39 = vld [vmem:[%s2517_s10 + $0x7ec] sm:%s2695_s8] }
  0xb5   : > { %778 = vst [vmem:[%s2520_s11 + $0x130] sm:%s2695_s8] %v777_v38  ;;  %780 = vst [vmem:[%s2520_s11 + $0x138] sm:%s2695_s8] %v779_v39 }
  0xb6   : > { %v781_v40 = vld [vmem:[%s2517_s10 + $0x820] sm:%s2695_s8]  ;;  %v783_v41 = vld [vmem:[%s2517_s10 + $0x854] sm:%s2695_s8] }
  0xb7   : > { %782 = vst [vmem:[%s2520_s11 + $0x140] sm:%s2695_s8] %v781_v40  ;;  %784 = vst [vmem:[%s2520_s11 + $0x148] sm:%s2695_s8] %v783_v41 }
  0xb8   : > { %v785_v42 = vld [vmem:[%s2517_s10 + $0x888] sm:%s2695_s8]  ;;  %v787_v43 = vld [vmem:[%s2517_s10 + $0x8bc] sm:%s2695_s8] }
  0xb9   : > { %786 = vst [vmem:[%s2520_s11 + $0x150] sm:%s2695_s8] %v785_v42  ;;  %788 = vst [vmem:[%s2520_s11 + $0x158] sm:%s2695_s8] %v787_v43 }
  0xba   : > { %v789_v44 = vld [vmem:[%s2517_s10 + $0x8f0] sm:%s2695_s8]  ;;  %v791_v45 = vld [vmem:[%s2517_s10 + $0x924] sm:%s2695_s8] }
  0xbb   : > { %790 = vst [vmem:[%s2520_s11 + $0x160] sm:%s2695_s8] %v789_v44  ;;  %792 = vst [vmem:[%s2520_s11 + $0x168] sm:%s2695_s8] %v791_v45 }
  0xbc   : > { %v793_v46 = vld [vmem:[%s2517_s10 + $0x958] sm:%s2695_s8]  ;;  %v795_v47 = vld [vmem:[%s2517_s10 + $0x98c] sm:%s2695_s8] }
  0xbd   : > { %794 = vst [vmem:[%s2520_s11 + $0x170] sm:%s2695_s8] %v793_v46  ;;  %796 = vst [vmem:[%s2520_s11 + $0x178] sm:%s2695_s8] %v795_v47 }
  0xbe   : > { %v797_v48 = vld [vmem:[%s2517_s10 + $0x9c0] sm:%s2695_s8]  ;;  %v799_v49 = vld [vmem:[%s2517_s10 + $0x9f4] sm:%s2695_s8] }
  0xbf   : > { %798 = vst [vmem:[%s2520_s11 + $0x180] sm:%s2695_s8] %v797_v48  ;;  %800 = vst [vmem:[%s2520_s11 + $0x188] sm:%s2695_s8] %v799_v49 }
  0xc0   : > { %v801_v50 = vld [vmem:[%s2517_s10 + $0xa28] sm:%s2695_s8]  ;;  %v803_v51 = vld [vmem:[%s2517_s10 + $0xa5c] sm:%s2695_s8] }
  0xc1   : > { %802 = vst [vmem:[%s2520_s11 + $0x190] sm:%s2695_s8] %v801_v50  ;;  %804 = vst [vmem:[%s2520_s11 + $0x198] sm:%s2695_s8] %v803_v51 }
  0xc2   : > { %v805_v52 = vld [vmem:[%s2517_s10 + $0xa90] sm:%s2695_s8]  ;;  %v807_v53 = vld [vmem:[%s2517_s10 + $0xac4] sm:%s2695_s8] }
  0xc3   : > { %806 = vst [vmem:[%s2520_s11 + $0x1a0] sm:%s2695_s8] %v805_v52  ;;  %808 = vst [vmem:[%s2520_s11 + $0x1a8] sm:%s2695_s8] %v807_v53 }
  0xc4   : > { %v809_v54 = vld [vmem:[%s2517_s10 + $0xaf8] sm:%s2695_s8]  ;;  %v811_v55 = vld [vmem:[%s2517_s10 + $0xb2c] sm:%s2695_s8] }
  0xc5   : > { %810 = vst [vmem:[%s2520_s11 + $0x1b0] sm:%s2695_s8] %v809_v54  ;;  %812 = vst [vmem:[%s2520_s11 + $0x1b8] sm:%s2695_s8] %v811_v55 }
  0xc6   : > { %v813_v56 = vld [vmem:[%s2517_s10 + $0xb60] sm:%s2695_s8]  ;;  %v815_v57 = vld [vmem:[%s2517_s10 + $0xb94] sm:%s2695_s8] }
  0xc7   : > { %814 = vst [vmem:[%s2520_s11 + $0x1c0] sm:%s2695_s8] %v813_v56  ;;  %816 = vst [vmem:[%s2520_s11 + $0x1c8] sm:%s2695_s8] %v815_v57 }
  0xc8   : > { %v817_v58 = vld [vmem:[%s2517_s10 + $0xbc8] sm:%s2695_s8]  ;;  %v819_v59 = vld [vmem:[%s2517_s10 + $0xbfc] sm:%s2695_s8] }
  0xc9   : > { %818 = vst [vmem:[%s2520_s11 + $0x1d0] sm:%s2695_s8] %v817_v58  ;;  %820 = vst [vmem:[%s2520_s11 + $0x1d8] sm:%s2695_s8] %v819_v59 }
  0xca   : > { %v821_v60 = vld [vmem:[%s2517_s10 + $0xc30] sm:%s2695_s8]  ;;  %v823_v61 = vld [vmem:[%s2517_s10 + $0xc64] sm:%s2695_s8] }
  0xcb   : > { %822 = vst [vmem:[%s2520_s11 + $0x1e0] sm:%s2695_s8] %v821_v60  ;;  %824 = vst [vmem:[%s2520_s11 + $0x1e8] sm:%s2695_s8] %v823_v61 }
  0xcc   : > { %v825_v62 = vld [vmem:[%s2517_s10 + $0xc98] sm:%s2695_s8]  ;;  %v827_v63 = vld [vmem:[%s2517_s10 + $0xccc] sm:%s2695_s8] }
  0xcd   : > { %826 = vst [vmem:[%s2520_s11 + $0x1f0] sm:%s2695_s8] %v825_v62  ;;  %828 = vst [vmem:[%s2520_s11 + $0x1f8] sm:%s2695_s8] %v827_v63 }
  0xce PF: > { %p1765_p10 = scmp.ge.u32.totalorder %s2324_s16, 8 }
  0xcf   : > { %s2225_s24 = smov (!%p1765_p10), 0  }
  0xd0   : > { %247 = sbr.rel (%p1765_p10) target bundleno = 273 (0x111), region = 40  ;;  %s2955_s15 = sshllo.u32 (!%p1765_p10), %s2225_s24, %s2324_s16 }
  0xd1   : > { %v257_v0 = vld [vmem:[%s2322_s14] sm:%s2955_s15] (!%p1765_p10)  ;;  %v259_v1 = vld [vmem:[%s2322_s14 + $0x34] sm:%s2955_s15] (!%p1765_p10) }
  0xd2   : > { %258 = vst [vmem:[%s2326_s17] sm:%s2955_s15] (!%p1765_p10), %v257_v0  ;;  %260 = vst [vmem:[%s2326_s17 + $0x8] sm:%s2955_s15] (!%p1765_p10), %v259_v1 }
  0xd3   : > { %v261_v2 = vld [vmem:[%s2322_s14 + $0x68] sm:%s2955_s15] (!%p1765_p10)  ;;  %v263_v3 = vld [vmem:[%s2322_s14 + $0x9c] sm:%s2955_s15] (!%p1765_p10) }
  0xd4   : > { %262 = vst [vmem:[%s2326_s17 + $0x10] sm:%s2955_s15] (!%p1765_p10), %v261_v2  ;;  %264 = vst [vmem:[%s2326_s17 + $0x18] sm:%s2955_s15] (!%p1765_p10), %v263_v3 }
  0xd5   : > { %v265_v4 = vld [vmem:[%s2322_s14 + $0xd0] sm:%s2955_s15] (!%p1765_p10)  ;;  %v267_v5 = vld [vmem:[%s2322_s14 + $0x104] sm:%s2955_s15] (!%p1765_p10) }
  0xd6   : > { %266 = vst [vmem:[%s2326_s17 + $0x20] sm:%s2955_s15] (!%p1765_p10), %v265_v4  ;;  %268 = vst [vmem:[%s2326_s17 + $0x28] sm:%s2955_s15] (!%p1765_p10), %v267_v5 }
  0xd7   : > { %v269_v6 = vld [vmem:[%s2322_s14 + $0x138] sm:%s2955_s15]  ;;  %v271_v7 = vld [vmem:[%s2322_s14 + $0x16c] sm:%s2955_s15] }
  0xd8   : > { %270 = vst [vmem:[%s2326_s17 + $0x30] sm:%s2955_s15] %v269_v6  ;;  %272 = vst [vmem:[%s2326_s17 + $0x38] sm:%s2955_s15] %v271_v7 }
  0xd9   : > { %v273_v8 = vld [vmem:[%s2322_s14 + $0x1a0] sm:%s2955_s15]  ;;  %v275_v9 = vld [vmem:[%s2322_s14 + $0x1d4] sm:%s2955_s15] }
  0xda   : > { %274 = vst [vmem:[%s2326_s17 + $0x40] sm:%s2955_s15] %v273_v8  ;;  %276 = vst [vmem:[%s2326_s17 + $0x48] sm:%s2955_s15] %v275_v9 }
  0xdb   : > { %v277_v10 = vld [vmem:[%s2322_s14 + $0x208] sm:%s2955_s15]  ;;  %v279_v11 = vld [vmem:[%s2322_s14 + $0x23c] sm:%s2955_s15] }
  0xdc   : > { %278 = vst [vmem:[%s2326_s17 + $0x50] sm:%s2955_s15] %v277_v10  ;;  %280 = vst [vmem:[%s2326_s17 + $0x58] sm:%s2955_s15] %v279_v11 }
  0xdd   : > { %v281_v12 = vld [vmem:[%s2322_s14 + $0x270] sm:%s2955_s15]  ;;  %v283_v13 = vld [vmem:[%s2322_s14 + $0x2a4] sm:%s2955_s15] }
  0xde   : > { %282 = vst [vmem:[%s2326_s17 + $0x60] sm:%s2955_s15] %v281_v12  ;;  %284 = vst [vmem:[%s2326_s17 + $0x68] sm:%s2955_s15] %v283_v13 }
  0xdf   : > { %v285_v14 = vld [vmem:[%s2322_s14 + $0x2d8] sm:%s2955_s15]  ;;  %v287_v15 = vld [vmem:[%s2322_s14 + $0x30c] sm:%s2955_s15] }
  0xe0   : > { %286 = vst [vmem:[%s2326_s17 + $0x70] sm:%s2955_s15] %v285_v14  ;;  %288 = vst [vmem:[%s2326_s17 + $0x78] sm:%s2955_s15] %v287_v15 }
  0xe1   : > { %v289_v16 = vld [vmem:[%s2322_s14 + $0x340] sm:%s2955_s15]  ;;  %v291_v17 = vld [vmem:[%s2322_s14 + $0x374] sm:%s2955_s15] }
  0xe2   : > { %290 = vst [vmem:[%s2326_s17 + $0x80] sm:%s2955_s15] %v289_v16  ;;  %292 = vst [vmem:[%s2326_s17 + $0x88] sm:%s2955_s15] %v291_v17 }
  0xe3   : > { %v293_v18 = vld [vmem:[%s2322_s14 + $0x3a8] sm:%s2955_s15]  ;;  %v295_v19 = vld [vmem:[%s2322_s14 + $0x3dc] sm:%s2955_s15] }
  0xe4   : > { %294 = vst [vmem:[%s2326_s17 + $0x90] sm:%s2955_s15] %v293_v18  ;;  %296 = vst [vmem:[%s2326_s17 + $0x98] sm:%s2955_s15] %v295_v19 }
  0xe5   : > { %v297_v20 = vld [vmem:[%s2322_s14 + $0x410] sm:%s2955_s15]  ;;  %v299_v21 = vld [vmem:[%s2322_s14 + $0x444] sm:%s2955_s15] }
  0xe6   : > { %298 = vst [vmem:[%s2326_s17 + $0xa0] sm:%s2955_s15] %v297_v20  ;;  %300 = vst [vmem:[%s2326_s17 + $0xa8] sm:%s2955_s15] %v299_v21 }
  0xe7   : > { %v301_v22 = vld [vmem:[%s2322_s14 + $0x478] sm:%s2955_s15]  ;;  %v303_v23 = vld [vmem:[%s2322_s14 + $0x4ac] sm:%s2955_s15] }
  0xe8   : > { %302 = vst [vmem:[%s2326_s17 + $0xb0] sm:%s2955_s15] %v301_v22  ;;  %304 = vst [vmem:[%s2326_s17 + $0xb8] sm:%s2955_s15] %v303_v23 }
  0xe9   : > { %v305_v24 = vld [vmem:[%s2322_s14 + $0x4e0] sm:%s2955_s15]  ;;  %v307_v25 = vld [vmem:[%s2322_s14 + $0x514] sm:%s2955_s15] }
  0xea   : > { %306 = vst [vmem:[%s2326_s17 + $0xc0] sm:%s2955_s15] %v305_v24  ;;  %308 = vst [vmem:[%s2326_s17 + $0xc8] sm:%s2955_s15] %v307_v25 }
  0xeb   : > { %v309_v26 = vld [vmem:[%s2322_s14 + $0x548] sm:%s2955_s15]  ;;  %v311_v27 = vld [vmem:[%s2322_s14 + $0x57c] sm:%s2955_s15] }
  0xec   : > { %310 = vst [vmem:[%s2326_s17 + $0xd0] sm:%s2955_s15] %v309_v26  ;;  %312 = vst [vmem:[%s2326_s17 + $0xd8] sm:%s2955_s15] %v311_v27 }
  0xed   : > { %v313_v28 = vld [vmem:[%s2322_s14 + $0x5b0] sm:%s2955_s15]  ;;  %v315_v29 = vld [vmem:[%s2322_s14 + $0x5e4] sm:%s2955_s15] }
  0xee   : > { %314 = vst [vmem:[%s2326_s17 + $0xe0] sm:%s2955_s15] %v313_v28  ;;  %316 = vst [vmem:[%s2326_s17 + $0xe8] sm:%s2955_s15] %v315_v29 }
  0xef   : > { %v317_v30 = vld [vmem:[%s2322_s14 + $0x618] sm:%s2955_s15]  ;;  %v319_v31 = vld [vmem:[%s2322_s14 + $0x64c] sm:%s2955_s15] }
  0xf0   : > { %318 = vst [vmem:[%s2326_s17 + $0xf0] sm:%s2955_s15] %v317_v30  ;;  %320 = vst [vmem:[%s2326_s17 + $0xf8] sm:%s2955_s15] %v319_v31 }
  0xf1   : > { %v321_v32 = vld [vmem:[%s2322_s14 + $0x680] sm:%s2955_s15]  ;;  %v323_v33 = vld [vmem:[%s2322_s14 + $0x6b4] sm:%s2955_s15] }
  0xf2   : > { %322 = vst [vmem:[%s2326_s17 + $0x100] sm:%s2955_s15] %v321_v32  ;;  %324 = vst [vmem:[%s2326_s17 + $0x108] sm:%s2955_s15] %v323_v33 }
  0xf3   : > { %v325_v34 = vld [vmem:[%s2322_s14 + $0x6e8] sm:%s2955_s15]  ;;  %v327_v35 = vld [vmem:[%s2322_s14 + $0x71c] sm:%s2955_s15] }
  0xf4   : > { %326 = vst [vmem:[%s2326_s17 + $0x110] sm:%s2955_s15] %v325_v34  ;;  %328 = vst [vmem:[%s2326_s17 + $0x118] sm:%s2955_s15] %v327_v35 }
  0xf5   : > { %v329_v36 = vld [vmem:[%s2322_s14 + $0x750] sm:%s2955_s15]  ;;  %v331_v37 = vld [vmem:[%s2322_s14 + $0x784] sm:%s2955_s15] }
  0xf6   : > { %330 = vst [vmem:[%s2326_s17 + $0x120] sm:%s2955_s15] %v329_v36  ;;  %332 = vst [vmem:[%s2326_s17 + $0x128] sm:%s2955_s15] %v331_v37 }
  0xf7   : > { %v333_v38 = vld [vmem:[%s2322_s14 + $0x7b8] sm:%s2955_s15]  ;;  %v335_v39 = vld [vmem:[%s2322_s14 + $0x7ec] sm:%s2955_s15] }
  0xf8   : > { %334 = vst [vmem:[%s2326_s17 + $0x130] sm:%s2955_s15] %v333_v38  ;;  %336 = vst [vmem:[%s2326_s17 + $0x138] sm:%s2955_s15] %v335_v39 }
  0xf9   : > { %v337_v40 = vld [vmem:[%s2322_s14 + $0x820] sm:%s2955_s15]  ;;  %v339_v41 = vld [vmem:[%s2322_s14 + $0x854] sm:%s2955_s15] }
  0xfa   : > { %338 = vst [vmem:[%s2326_s17 + $0x140] sm:%s2955_s15] %v337_v40  ;;  %340 = vst [vmem:[%s2326_s17 + $0x148] sm:%s2955_s15] %v339_v41 }
  0xfb   : > { %v341_v42 = vld [vmem:[%s2322_s14 + $0x888] sm:%s2955_s15]  ;;  %v343_v43 = vld [vmem:[%s2322_s14 + $0x8bc] sm:%s2955_s15] }
  0xfc   : > { %342 = vst [vmem:[%s2326_s17 + $0x150] sm:%s2955_s15] %v341_v42  ;;  %344 = vst [vmem:[%s2326_s17 + $0x158] sm:%s2955_s15] %v343_v43 }
  0xfd   : > { %v345_v44 = vld [vmem:[%s2322_s14 + $0x8f0] sm:%s2955_s15]  ;;  %v347_v45 = vld [vmem:[%s2322_s14 + $0x924] sm:%s2955_s15] }
  0xfe   : > { %346 = vst [vmem:[%s2326_s17 + $0x160] sm:%s2955_s15] %v345_v44  ;;  %348 = vst [vmem:[%s2326_s17 + $0x168] sm:%s2955_s15] %v347_v45 }
  0xff   : > { %v349_v46 = vld [vmem:[%s2322_s14 + $0x958] sm:%s2955_s15]  ;;  %v351_v47 = vld [vmem:[%s2322_s14 + $0x98c] sm:%s2955_s15] }
 0x100   : > { %350 = vst [vmem:[%s2326_s17 + $0x170] sm:%s2955_s15] %v349_v46  ;;  %352 = vst [vmem:[%s2326_s17 + $0x178] sm:%s2955_s15] %v351_v47 }
 0x101   : > { %v353_v48 = vld [vmem:[%s2322_s14 + $0x9c0] sm:%s2955_s15]  ;;  %v355_v49 = vld [vmem:[%s2322_s14 + $0x9f4] sm:%s2955_s15] }
 0x102   : > { %354 = vst [vmem:[%s2326_s17 + $0x180] sm:%s2955_s15] %v353_v48  ;;  %356 = vst [vmem:[%s2326_s17 + $0x188] sm:%s2955_s15] %v355_v49 }
 0x103   : > { %v357_v50 = vld [vmem:[%s2322_s14 + $0xa28] sm:%s2955_s15]  ;;  %v359_v51 = vld [vmem:[%s2322_s14 + $0xa5c] sm:%s2955_s15] }
 0x104   : > { %358 = vst [vmem:[%s2326_s17 + $0x190] sm:%s2955_s15] %v357_v50  ;;  %360 = vst [vmem:[%s2326_s17 + $0x198] sm:%s2955_s15] %v359_v51 }
 0x105   : > { %v361_v52 = vld [vmem:[%s2322_s14 + $0xa90] sm:%s2955_s15]  ;;  %v363_v53 = vld [vmem:[%s2322_s14 + $0xac4] sm:%s2955_s15] }
 0x106   : > { %362 = vst [vmem:[%s2326_s17 + $0x1a0] sm:%s2955_s15] %v361_v52  ;;  %364 = vst [vmem:[%s2326_s17 + $0x1a8] sm:%s2955_s15] %v363_v53 }
 0x107   : > { %v365_v54 = vld [vmem:[%s2322_s14 + $0xaf8] sm:%s2955_s15]  ;;  %v367_v55 = vld [vmem:[%s2322_s14 + $0xb2c] sm:%s2955_s15] }
 0x108   : > { %366 = vst [vmem:[%s2326_s17 + $0x1b0] sm:%s2955_s15] %v365_v54  ;;  %368 = vst [vmem:[%s2326_s17 + $0x1b8] sm:%s2955_s15] %v367_v55 }
 0x109   : > { %v369_v56 = vld [vmem:[%s2322_s14 + $0xb60] sm:%s2955_s15]  ;;  %v371_v57 = vld [vmem:[%s2322_s14 + $0xb94] sm:%s2955_s15] }
 0x10a   : > { %370 = vst [vmem:[%s2326_s17 + $0x1c0] sm:%s2955_s15] %v369_v56  ;;  %372 = vst [vmem:[%s2326_s17 + $0x1c8] sm:%s2955_s15] %v371_v57 }
 0x10b   : > { %v373_v58 = vld [vmem:[%s2322_s14 + $0xbc8] sm:%s2955_s15]  ;;  %v375_v59 = vld [vmem:[%s2322_s14 + $0xbfc] sm:%s2955_s15] }
 0x10c   : > { %374 = vst [vmem:[%s2326_s17 + $0x1d0] sm:%s2955_s15] %v373_v58  ;;  %376 = vst [vmem:[%s2326_s17 + $0x1d8] sm:%s2955_s15] %v375_v59 }
 0x10d   : > { %v377_v60 = vld [vmem:[%s2322_s14 + $0xc30] sm:%s2955_s15]  ;;  %v379_v61 = vld [vmem:[%s2322_s14 + $0xc64] sm:%s2955_s15] }
 0x10e   : > { %378 = vst [vmem:[%s2326_s17 + $0x1e0] sm:%s2955_s15] %v377_v60  ;;  %380 = vst [vmem:[%s2326_s17 + $0x1e8] sm:%s2955_s15] %v379_v61 }
 0x10f   : > { %v381_v62 = vld [vmem:[%s2322_s14 + $0xc98] sm:%s2955_s15]  ;;  %v383_v63 = vld [vmem:[%s2322_s14 + $0xccc] sm:%s2955_s15] }
 0x110   : > { %382 = vst [vmem:[%s2326_s17 + $0x1f0] sm:%s2955_s15] %v381_v62  ;;  %384 = vst [vmem:[%s2326_s17 + $0x1f8] sm:%s2955_s15] %v383_v63 }
 0x111 PF: > { %p1766_p11 = scmp.ge.s32.totalorder %s2190_s23, 1  ;;  %p864_p12 = scmp.lt.s32.totalorder %s2190_s23, 8 }
 0x113   : > { %p865_p13 = pnand %p1766_p11, %p864_p12 }
 0x114   : > { %s3216_s16 = sand.u32 (!%p865_p13), 1, %s2174_s19   ;;  %v978_v0 = vld [vmem:[%s3399_s0 + $0x8] sm:$0xff] (!%p865_p13)  ;;  %v980_v2 = vld [vmem:[%s3399_s0 + $0x18] sm:$0xff] (!%p865_p13)  ;;  %v2226_v5 = vmov (!%p865_p13), 1   ;;  %v2227_v6 = vmov (!%p865_p13), 0   ;;  %v1053_v8 = vld [vmem:[%s3400_s1] sm:$0xff] (!%p865_p13) }
 0x115   : > { %868 = sbr.rel (%p865_p13) target bundleno = 594 (0x252), region = 88  ;;  %v982_v1 = vld [vmem:[%s3399_s0 + $0x28] sm:$0xff] (!%p865_p13)  ;;  %s1767_s29 = sshll.u32 (!%p865_p13), %s3216_s16, 9  ;;  %v984_v4 = vld [vmem:[%s3399_s0 + $0x38] sm:$0xff] (!%p865_p13)  ;;  %1982 = vset.pattern.permute.xlu0 (!%p865_p13), %v2226_v5  ;;  %1983 = vset.pattern.permute.xlu1 (!%p865_p13), %v2227_v6 }
 0x116   : > { %v986_v3 = vpack.c.bf16 (!%p865_p13), %v982_v1, %v978_v0  ;;  %v988_v7 = vpack.c.bf16 (!%p865_p13), %v984_v4, %v980_v2  ;;  %s3234_s8 = scalar_lea.vmem (!%p865_p13), [#allocation2], %s1767_s29  ;;  %1090 = vperm.xlu0 (!%p865_p13), %1982, %v1053_v8   ;;  %1058 = vperm.xlu1 (!%p865_p13), %1983, %v1053_v8   ;;  %v1054_v55 = vld [vmem:[%s3400_s1 + $0x8] sm:$0xff] (!%p865_p13)  ;;  %v977_v8 = vld [vmem:[%s3399_s0] sm:$0xff] (!%p865_p13)  ;;  %s3316_s12 = sshll.u32 (!%p865_p13), %s2182_s21, 1 }
 0x117   : > { %v1984_v9 = vld [vmem:[%s3234_s8 + $0x4] ss:$8 sps:$4 sm:$0xff] (!%p865_p13)   ;;  %v1988_v11 = vld [vmem:[%s3234_s8] ss:$8 sps:$4 sm:$0xff] (!%p865_p13)   ;;  %v1990_v13 = vld [vmem:[%s3234_s8 + $0x14] ss:$8 sps:$4 sm:$0xff] (!%p865_p13)  }
 0x118   : > { %1491 = vmatprep.mubr.bf16.mxu1 (!%p865_p13), %v986_v3  ;;  %v1986_v10 = vld [vmem:[%s3234_s8 + $0x104] ss:$8 sps:$4 sm:$0xff] (!%p865_p13)   ;;  %1534 = vmatprep.mubr.bf16.mxu0 (!%p865_p13), %v988_v7  ;;  %v1989_v12 = vld [vmem:[%s3234_s8 + $0x100] ss:$8 sps:$4 sm:$0xff] (!%p865_p13)   ;;  %v1992_v14 = vld [vmem:[%s3234_s8 + $0x114] ss:$8 sps:$4 sm:$0xff] (!%p865_p13)  }
 0x119   : > { %1459 = vmatprep.subr.bf16.mxu1 (!%p865_p13), %v1984_v9  ;;  %1502 = vmatprep.subr.bf16.mxu0 (!%p865_p13), %v1986_v10  ;;  %v1994_v15 = vld [vmem:[%s3234_s8 + $0x10] ss:$8 sps:$4 sm:$0xff] (!%p865_p13)   ;;  %v1996_v17 = vld [vmem:[%s3234_s8 + $0x24] ss:$8 sps:$4 sm:$0xff] (!%p865_p13)   ;;  %v2000_v19 = vld [vmem:[%s3234_s8 + $0x20] ss:$8 sps:$4 sm:$0xff] (!%p865_p13)  }
 0x11a   : > { %1460 = vmatpush1.bf16.msra.mxu1 (!%p865_p13), %v1988_v11  ;;  %1503 = vmatpush1.bf16.msra.mxu0 (!%p865_p13), %v1989_v12  ;;  %v1995_v16 = vld [vmem:[%s3234_s8 + $0x110] ss:$8 sps:$4 sm:$0xff] (!%p865_p13)   ;;  %v1998_v18 = vld [vmem:[%s3234_s8 + $0x124] ss:$8 sps:$4 sm:$0xff] (!%p865_p13)   ;;  %v2001_v20 = vld [vmem:[%s3234_s8 + $0x120] ss:$8 sps:$4 sm:$0xff] (!%p865_p13)  }
 0x11b   : > { %1461 = vmatprep.subr.bf16.mxu1 (!%p865_p13), %v1990_v13  ;;  %1504 = vmatprep.subr.bf16.mxu0 (!%p865_p13), %v1992_v14  ;;  %v2002_v21 = vld [vmem:[%s3234_s8 + $0x34] ss:$8 sps:$4 sm:$0xff] (!%p865_p13)   ;;  %v2006_v23 = vld [vmem:[%s3234_s8 + $0x30] ss:$8 sps:$4 sm:$0xff] (!%p865_p13)   ;;  %v2008_v25 = vld [vmem:[%s3234_s8 + $0x44] ss:$8 sps:$4 sm:$0xff] (!%p865_p13)  }
 0x11c   : > { %v2004_v22 = vld [vmem:[%s3234_s8 + $0x134] ss:$8 sps:$4 sm:$0xff]   ;;  %v2007_v24 = vld [vmem:[%s3234_s8 + $0x130] ss:$8 sps:$4 sm:$0xff]   ;;  %v2010_v26 = vld [vmem:[%s3234_s8 + $0x144] ss:$8 sps:$4 sm:$0xff]   ;;  %1094 = vperm.xlu0 %1982, %v1054_v55   ;;  %1063 = vperm.xlu1 %1983, %v1054_v55  }
 0x11d   : > { %v2012_v27 = vld [vmem:[%s3234_s8 + $0x40] ss:$8 sps:$4 sm:$0xff]   ;;  %v2014_v29 = vld [vmem:[%s3234_s8 + $0x54] ss:$8 sps:$4 sm:$0xff]   ;;  %v2018_v31 = vld [vmem:[%s3234_s8 + $0x50] ss:$8 sps:$4 sm:$0xff]  }
 0x11e   : > { %1462 = vmatpush1.bf16.msra.mxu1 %v1994_v15  ;;  %1505 = vmatpush1.bf16.msra.mxu0 %v1995_v16  ;;  %v2013_v28 = vld [vmem:[%s3234_s8 + $0x140] ss:$8 sps:$4 sm:$0xff]   ;;  %v2016_v30 = vld [vmem:[%s3234_s8 + $0x154] ss:$8 sps:$4 sm:$0xff]   ;;  %v2019_v32 = vld [vmem:[%s3234_s8 + $0x150] ss:$8 sps:$4 sm:$0xff]   ;;  %v1067_v16 = vlaneseq }
 0x11f   : > { %1463 = vmatprep.subr.bf16.mxu1 %v1996_v17  ;;  %1506 = vmatprep.subr.bf16.mxu0 %v1998_v18  ;;  %v2020_v33 = vld [vmem:[%s3234_s8 + $0x64] ss:$8 sps:$4 sm:$0xff]   ;;  %v2024_v35 = vld [vmem:[%s3234_s8 + $0x60] ss:$8 sps:$4 sm:$0xff]   ;;  %v2026_v37 = vld [vmem:[%s3234_s8 + $0x74] ss:$8 sps:$4 sm:$0xff]  }
 0x120   : > { %v2022_v34 = vld [vmem:[%s3234_s8 + $0x164] ss:$8 sps:$4 sm:$0xff]   ;;  %v2025_v36 = vld [vmem:[%s3234_s8 + $0x160] ss:$8 sps:$4 sm:$0xff]   ;;  %v2028_v38 = vld [vmem:[%s3234_s8 + $0x174] ss:$8 sps:$4 sm:$0xff]  }
 0x121   : > { %v2030_v39 = vld [vmem:[%s3234_s8 + $0x70] ss:$8 sps:$4 sm:$0xff]   ;;  %v2032_v41 = vld [vmem:[%s3234_s8 + $0x84] ss:$8 sps:$4 sm:$0xff]   ;;  %v2036_v43 = vld [vmem:[%s3234_s8 + $0x80] ss:$8 sps:$4 sm:$0xff]  }
 0x122   : > { %1464 = vmatpush1.bf16.msra.mxu1 %v2000_v19  ;;  %1507 = vmatpush1.bf16.msra.mxu0 %v2001_v20  ;;  %v2031_v40 = vld [vmem:[%s3234_s8 + $0x170] ss:$8 sps:$4 sm:$0xff]   ;;  %v2034_v42 = vld [vmem:[%s3234_s8 + $0x184] ss:$8 sps:$4 sm:$0xff]   ;;  %v2037_v44 = vld [vmem:[%s3234_s8 + $0x180] ss:$8 sps:$4 sm:$0xff]  }
 0x123   : > { %1465 = vmatprep.subr.bf16.mxu1 %v2002_v21  ;;  %1508 = vmatprep.subr.bf16.mxu0 %v2004_v22  ;;  %v2038_v45 = vld [vmem:[%s3234_s8 + $0x94] ss:$8 sps:$4 sm:$0xff]   ;;  %v2042_v47 = vld [vmem:[%s3234_s8 + $0x90] ss:$8 sps:$4 sm:$0xff]   ;;  %v2044_v49 = vld [vmem:[%s3234_s8 + $0xa4] ss:$8 sps:$4 sm:$0xff]  }
 0x124   : > { %v2040_v46 = vld [vmem:[%s3234_s8 + $0x194] ss:$8 sps:$4 sm:$0xff]   ;;  %v2043_v48 = vld [vmem:[%s3234_s8 + $0x190] ss:$8 sps:$4 sm:$0xff]   ;;  %v2046_v50 = vld [vmem:[%s3234_s8 + $0x1a4] ss:$8 sps:$4 sm:$0xff]  }
 0x125   : > { %v2048_v51 = vld [vmem:[%s3234_s8 + $0xa0] ss:$8 sps:$4 sm:$0xff]   ;;  %v2050_v53 = vld [vmem:[%s3234_s8 + $0xb4] ss:$8 sps:$4 sm:$0xff]   ;;  %v2054_v56 = vld [vmem:[%s3234_s8 + $0xb0] ss:$8 sps:$4 sm:$0xff]  }
 0x126   : > { %1466 = vmatpush1.bf16.msra.mxu1 %v2006_v23  ;;  %1509 = vmatpush1.bf16.msra.mxu0 %v2007_v24  ;;  %v2049_v52 = vld [vmem:[%s3234_s8 + $0x1a0] ss:$8 sps:$4 sm:$0xff]   ;;  %v2052_v54 = vld [vmem:[%s3234_s8 + $0x1b4] ss:$8 sps:$4 sm:$0xff]   ;;  %v2055_v57 = vld [vmem:[%s3234_s8 + $0x1b0] ss:$8 sps:$4 sm:$0xff]  }
 0x127   : > { %1467 = vmatprep.subr.bf16.mxu1 %v2008_v25  ;;  %1510 = vmatprep.subr.bf16.mxu0 %v2010_v26  ;;  %v2056_v58 = vld [vmem:[%s3234_s8 + $0xc4] ss:$8 sps:$4 sm:$0xff]   ;;  %v2060_v60 = vld [vmem:[%s3234_s8 + $0xc0] ss:$8 sps:$4 sm:$0xff]   ;;  %v2062_v62 = vld [vmem:[%s3234_s8 + $0xd4] ss:$8 sps:$4 sm:$0xff]  }
 0x128   : > { %v2058_v59 = vld [vmem:[%s3234_s8 + $0x1c4] ss:$8 sps:$4 sm:$0xff]   ;;  %v2061_v61 = vld [vmem:[%s3234_s8 + $0x1c0] ss:$8 sps:$4 sm:$0xff]   ;;  %v2064_v63 = vld [vmem:[%s3234_s8 + $0x1d4] ss:$8 sps:$4 sm:$0xff]  }
 0x129   : > { %v2066_v0 = vld [vmem:[%s3234_s8 + $0xd0] ss:$8 sps:$4 sm:$0xff]   ;;  %v2068_v2 = vld [vmem:[%s3234_s8 + $0xe4] ss:$8 sps:$4 sm:$0xff]   ;;  %v2072_v4 = vld [vmem:[%s3234_s8 + $0xe0] ss:$8 sps:$4 sm:$0xff]  }
 0x12a   : > { %1468 = vmatpush1.bf16.msra.mxu1 %v2012_v27  ;;  %1511 = vmatpush1.bf16.msra.mxu0 %v2013_v28  ;;  %v2067_v1 = vld [vmem:[%s3234_s8 + $0x1d0] ss:$8 sps:$4 sm:$0xff]   ;;  %v2070_v3 = vld [vmem:[%s3234_s8 + $0x1e4] ss:$8 sps:$4 sm:$0xff]   ;;  %v2073_v5 = vld [vmem:[%s3234_s8 + $0x1e0] ss:$8 sps:$4 sm:$0xff]  }
 0x12b   : > { %1469 = vmatprep.subr.bf16.mxu1 %v2014_v29  ;;  %1512 = vmatprep.subr.bf16.mxu0 %v2016_v30  ;;  %v2074_v6 = vld [vmem:[%s3234_s8 + $0xf4] ss:$8 sps:$4 sm:$0xff]   ;;  %v981_v9 = vld [vmem:[%s3399_s0 + $0x20] sm:$0xff]  ;;  %v2078_v11 = vld [vmem:[%s3234_s8 + $0xf0] ss:$8 sps:$4 sm:$0xff]   ;;  %p949_p0 = scmp.lt.s32.totalorder %s3316_s12, 12 }
 0x12c   : > { %v2076_v7 = vld [vmem:[%s3234_s8 + $0x1f4] ss:$8 sps:$4 sm:$0xff]   ;;  %v2079_v12 = vld [vmem:[%s3234_s8 + $0x1f0] ss:$8 sps:$4 sm:$0xff]   ;;  %v985_v14 = vpack.c.bf16 %v981_v9, %v977_v8  ;;  %v1068_v17 = vshrl.u32 %v1067_v16, 7  ;;  %s1768_s17 = sshll.u32 %s3216_s16, 5 }
 0x12d   : > { %v979_v10 = vld [vmem:[%s3399_s0 + $0x10] sm:$0xff]  ;;  %s950_s13 = scalar_select %p949_p0, %s3316_s12, 12 }
 0x12e   : > { %1470 = vmatpush1.bf16.msra.mxu1 %v2018_v31  ;;  %1513 = vmatpush1.bf16.msra.mxu0 %v2019_v32  ;;  %v983_v13 = vld [vmem:[%s3399_s0 + $0x30] sm:$0xff]  ;;  %v1099_v18 = vsub.s32 1, %v1068_v17  ;;  %v1103_v20 = vsub.s32 3, %v1068_v17  ;;  %v1069_v21 = vsub.s32 0, %v1068_v17  ;;  %v1073_v25 = vsub.s32 2, %v1068_v17  ;;  %s925_s25 = scalar_lea.vmem [#allocation3], %s1768_s17 }
 0x12f   : > { %1471 = vmatprep.subr.bf16.mxu1 %v2020_v33  ;;  %1514 = vmatprep.subr.bf16.mxu0 %v2022_v34  ;;  %v987_v15 = vpack.c.bf16 %v983_v13, %v979_v10  ;;  %s1770_s9 = sshll.u32 %s950_s13, 1  ;;  %s965_s14 = scalar_lea.vmem %s3403_s4, %s950_s13 }
 0x130   : > { %s952_s15 = scalar_lea.vmem %s3402_s3, %s1770_s9  ;;  %v1119_v28 = vld [vmem:[%s965_s14] sm:$0x3]  ;;  %s1550_s27 = scalar_lea.sflag [#allocation4], %s3216_s16 }
 0x131   : > { %v1055_v19 = vld [vmem:[%s952_s15] sm:$0xf]  ;;  %v1124_v33 = vrot.slane %v1119_v28, %v1069_v21  ;;  %s1559_s29 = ssub.s32 (%p2300_p5), 13, %s3316_s12 }
 0x132   : > { %1472 = vmatpush1.bf16.msra.mxu1 %v2024_v35  ;;  %1515 = vmatpush1.bf16.msra.mxu0 %v2025_v36  ;;  %v1100_v22 = vrot.slane %v1055_v19, %v1099_v18  ;;  %v1104_v24 = vrot.slane %v1055_v19, %v1103_v20  ;;  %v1070_v27 = vrot.slane %v1055_v19, %v1069_v21  ;;  %p1560_p1 = scmp.lt.s32.totalorder (%p2300_p5), %s1559_s29, 2 }
 0x133   : > { %1473 = vmatprep.subr.bf16.mxu1 %v2026_v37  ;;  %1516 = vmatprep.subr.bf16.mxu0 %v2028_v38  ;;  %v1074_v31 = vrot.slane %v1055_v19, %v1073_v25  ;;  %v1128_v37 = vrot.slane %v1119_v28, %v1099_v18 }
 0x134   : > { %v1110_v26 = vrot.slane %v1100_v22, %v1099_v18  ;;  %v1114_v29 = vrot.slane %v1104_v24, %v1099_v18  ;;  %v1080_v34 = vrot.slane %v1070_v27, %v1069_v21 }
 0x135   : > { %v1084_v38 = vrot.slane %v1074_v31, %v1069_v21 }
 0x136   : > { %1474 = vmatpush1.bf16.msra.mxu1 %v2030_v39  ;;  %1517 = vmatpush1.bf16.msra.mxu0 %v2031_v40 }
 0x137   : > { %1475 = vmatprep.subr.bf16.mxu1 %v2032_v41  ;;  %1518 = vmatprep.subr.bf16.mxu0 %v2034_v42 }
 0x13a   : > { %1476 = vmatpush1.bf16.msra.mxu1 %v2036_v43  ;;  %1519 = vmatpush1.bf16.msra.mxu0 %v2037_v44 }
 0x13b   : > { %1477 = vmatprep.subr.bf16.mxu1 %v2038_v45  ;;  %1520 = vmatprep.subr.bf16.mxu0 %v2040_v46 }
 0x13e   : > { %1478 = vmatpush1.bf16.msra.mxu1 %v2042_v47  ;;  %1521 = vmatpush1.bf16.msra.mxu0 %v2043_v48 }
 0x13f   : > { %1479 = vmatprep.subr.bf16.mxu1 %v2044_v49  ;;  %1522 = vmatprep.subr.bf16.mxu0 %v2046_v50 }
 0x142   : > { %1480 = vmatpush1.bf16.msra.mxu1 %v2048_v51  ;;  %1523 = vmatpush1.bf16.msra.mxu0 %v2049_v52 }
 0x143   : > { %1481 = vmatprep.subr.bf16.mxu1 %v2050_v53  ;;  %1524 = vmatprep.subr.bf16.mxu0 %v2052_v54 }
 0x146   : > { %1482 = vmatpush1.bf16.msra.mxu1 %v2054_v56  ;;  %1525 = vmatpush1.bf16.msra.mxu0 %v2055_v57 }
 0x147   : > { %1483 = vmatprep.subr.bf16.mxu1 %v2056_v58  ;;  %1526 = vmatprep.subr.bf16.mxu0 %v2058_v59 }
 0x14a   : > { %1484 = vmatpush1.bf16.msra.mxu1 %v2060_v60  ;;  %1527 = vmatpush1.bf16.msra.mxu0 %v2061_v61 }
 0x14b   : > { %1485 = vmatprep.subr.bf16.mxu1 %v2062_v62  ;;  %1528 = vmatprep.subr.bf16.mxu0 %v2064_v63 }
 0x14e   : > { %1486 = vmatpush1.bf16.msra.mxu1 %v2066_v0  ;;  %1529 = vmatpush1.bf16.msra.mxu0 %v2067_v1 }
 0x14f   : > { %1487 = vmatprep.subr.bf16.mxu1 %v2068_v2  ;;  %1530 = vmatprep.subr.bf16.mxu0 %v2070_v3 }
 0x152   : > { %1488 = vmatpush1.bf16.msra.mxu1 %v2072_v4  ;;  %1531 = vmatpush1.bf16.msra.mxu0 %v2073_v5 }
 0x153   : > { %1489 = vmatprep.subr.bf16.mxu1 %v2074_v6  ;;  %1532 = vmatprep.subr.bf16.mxu0 %v2076_v7 }
 0x156   : > { %1490 = vmatpush1.bf16.msra.mxu1 %v2078_v11  ;;  %1533 = vmatpush1.bf16.msra.mxu0 %v2079_v12 }
 0x159   : > { %1492 = vmatmul.mubr.bf16.vlgmr.msra.gmra.mrb[0].mxu1 %v985_v14  ;;  %1535 = vmatmul.mubr.bf16.vlgmr.msra.gmra.mrb[0].mxu0 %v987_v15 }
 0x195   : > { %v1091_v23 = vpop.permute.xlu0 %1090  ;;  %v1059_v30 = vpop.permute.xlu1 %1058 }
 0x196   : > { %v1115_v32 = vmul.f32 %v1110_v26, %v1091_v23  ;;  %v1116_v36 = vmul.f32 %v1114_v29, %v1091_v23  ;;  %v1085_v40 = vmul.f32 %v1080_v34, %v1059_v30  ;;  %v1086_v45 = vmul.f32 %v1084_v38, %v1059_v30 }
 0x198   : > { %v1131_v39 = vadd.f32 %v1124_v33, %v1115_v32  ;;  %v1132_v44 = vadd.f32 %v1128_v37, %v1116_v36 }
 0x19a   : > { %v1135_v48 = vadd.f32 %v1131_v39, %v1085_v40  ;;  %v1136_v53 = vadd.f32 %v1132_v44, %v1086_v45 }
 0x19b   : > { %v1095_v35 = vpop.permute.xlu0 %1094  ;;  %v1064_v43 = vpop.permute.xlu1 %1063 }
 0x19c   : > { %v1117_v41 = vmul.f32 %v1110_v26, %v1095_v35  ;;  %v1118_v42 = vmul.f32 %v1114_v29, %v1095_v35  ;;  %v1087_v47 = vmul.f32 %v1080_v34, %v1064_v43  ;;  %v1088_v50 = vmul.f32 %v1084_v38, %v1064_v43 }
 0x19e   : > { %v1133_v46 = vadd.f32 %v1124_v33, %v1117_v41  ;;  %v1134_v49 = vadd.f32 %v1128_v37, %v1118_v42 }
 0x1a0   : > { %v1137_v57 = vadd.f32 %v1133_v46, %v1087_v47  ;;  %v1138_v61 = vadd.f32 %v1134_v49, %v1088_v50 }
 0x22c   : > { %v1493_v51 = vpop.f32.mrb[0].mxu1  ;;  %v1536_v52 = vpop.f32.mrb[0].mxu0 }
 0x22d   : > { %v1494_v54 = vadd.f32 %v1493_v51, %v1135_v48  ;;  %v1495_v55 = vpop.f32.mrb[1].mxu1  ;;  %v1538_v56 = vpop.f32.mrb[1].mxu0 }
 0x22e   : > { %v1496_v58 = vadd.f32 %v1495_v55, %v1136_v53  ;;  %v1497_v59 = vpop.f32.mrb[2].mxu1  ;;  %v1540_v60 = vpop.f32.mrb[2].mxu0  ;;  %1556 = sbr.rel (!%p2300_p5) target bundleno = 594 (0x252), region = 96 }
 0x22f   : > { %v1537_v62 = vadd.f32 %v1536_v52, %v1494_v54  ;;  %v1498_v63 = vadd.f32 %v1497_v59, %v1137_v57  ;;  %v1499_v0 = vpop.f32.mrb[3].mxu1  ;;  %v1542_v1 = vpop.f32.mrb[3].mxu0 }
 0x230   : > { %v1539_v2 = vadd.f32 %v1538_v56, %v1496_v58  ;;  %v1500_v3 = vadd.f32 %v1499_v0, %v1138_v61 }
 0x231   : > { %1545 = vst [vmem:[%s925_s25] sm:$0xff] %v1537_v62  ;;  %v1541_v4 = vadd.f32 %v1540_v60, %v1498_v63 }
 0x232   : > { %1546 = vst [vmem:[%s925_s25 + $0x8] sm:$0xff] %v1539_v2  ;;  %v1543_v5 = vadd.f32 %v1542_v1, %v1500_v3 }
 0x233   : > { %1547 = vst [vmem:[%s925_s25 + $0x10] sm:$0xff] %v1541_v4 }
 0x234   : > { %1548 = vst [vmem:[%s925_s25 + $0x18] sm:$0xff] %v1543_v5 }
 0x235   : > { %s3431_s29 = smov (!%p1560_p1, %s1559_s29), 2 }
 0x236   : > { %s3334_s7 = sshll.u32 %s3431_s29, 8 }
 0x237   : > { %s1564_s13 = ssub.s32 512, %s3334_s7 }
 0x238   : > { %1565 = vsyncadd %s1550_s27, %s1564_s13  ;;  %p1839_p2 = scmp.ne.s32.totalorder %s3334_s7, 0  ;;  %s1847_s28 = sshll.u32 %s2182_s21, 8 }
 0x239   : > { %s3344_s12 = scalar_lea.hbm %s3404_s5, %s1847_s28  ;;  %s1841_s24 = sshll.u32 %s3431_s29, 3 }
 0x23a   : > { %s1573_s15 = sshll.u32 %s925_s25, 4  ;;  %s2228_s11 = smov [#allocation3]   ;;  %s3347_s15 = int_to_ptr.vmem [resolvable:$true] %s1573_s15 }
 0x23b   : > { %s2080_s10 = scalar_lea.vmem %s3347_s15, %s3334_s7  ;;  %s2084_s14 = sshll.u32 %s2228_s11, 4  ;;  %s2085_s14 = int_to_ptr.vmem [resolvable:$false] %s2084_s14 }
 0x23c   : > { %p2081_p5 = scmp.ne.s32.totalorder %s3347_s15, %s2080_s10  ;;  %s2086_s21 = scalar_lea.vmem %s2085_s14, 1024 }
 0x23d   : > { %p2087_p6 = scmp.lt.s32.totalorder %s3347_s15, %s2085_s14  ;;  %p2088_p7 = scmp.lt.s32.totalorder %s2086_s21, %s2080_s10 }
 0x23e   : > { %p2082_p3 = pnand %p2081_p5, %p1839_p2 }
 0x23f   : > { %p2089_p8 = por %p2088_p7, %p2087_p6 }
 0x240   : > { %p2083_p4 = pneg %p2082_p3 }
 0x242   : > { %p2090_p10 = pnand %p2089_p8, %p2083_p4 }
 0x244   : > { %2093 = shalt.err (!%p2090_p10)
}
 0x245   : > { %s2094_s17 = scalar_lea.hbm %s3344_s12, %s3334_s7  ;;  %s2098_s28 = scalar_lea.hbm %s3404_s5, 3328 }
 0x246   : > { %p2095_p11 = scmp.ne.s32.totalorder %s3344_s12, %s2094_s17  ;;  %p2099_p0 = scmp.lt.u32.totalorder %s3344_s12, %s3404_s5 }
 0x247   : > { %p2100_p1 = scmp.lt.u32.totalorder %s2098_s28, %s2094_s17  ;;  %p2102_p3 = scmp.lt.u32.totalorder %s2094_s17, %s3344_s12 }
 0x248   : > { %p2096_p12 = pnand %p2095_p11, %p1839_p2 }
 0x249   : > { %p2101_p5 = por %p2100_p1, %p2099_p0 }
 0x24a   : > { %p2097_p13 = pneg %p2096_p12 }
 0x24b   : > { %p2103_p4 = por %p2102_p3, %p2101_p5 }
 0x24d   : > { %p2104_p6 = pnand %p2103_p4, %p2097_p13 }
 0x24f   : > { %2107 = shalt.err (!%p2104_p6)
}
 0x250   : > { %s2229_s10 = smov 256   ;;  %s2230_s11 = smov 1664  }
 0x251   : > { %1579 = dma.vmem_to_hbm [thread:$0]  (%p1839_p2), %s3347_s15, %s3334_s7, %s3344_s12, %s1550_s27, %s2229_s10, %s2230_s11, %s1841_s24  }
 0x252 PF: > { %p1863_p7 = scmp.ge.s32.totalorder %s2190_s23, 2  ;;  %s1588_s14 = sand.u32 1, %s2170_s18  }
 0x253   : > { %s1589_s21 = scalar_lea.sflag [#allocation4], %s1588_s14 }
 0x254   : > { %p1860_p8 = pnand %p1863_p7, %p2311_p9 }
 0x256   : > { %2165 = dma.done.wait (!%p1860_p8), %s1589_s21, 512  }
 0x257   : > { %2167 = vsyncadd (!%p1860_p8), %s1589_s21, 4294966784  ;;  %s18_s23 = sadd.s32 1, %s2190_s23   ;;  %s3417_s18 = smov %s2174_s19 }
 0x258   : > { %p15_p10 = scmp.ge.s32.totalorder %s18_s23, 9   ;;  %s3418_s19 = smov %s2178_s20 }
 0x259   : > { %s3419_s20 = smov %s2309_s30  ;;  %s3420_s21 = smov %s2186_s22 }
 0x25a   : > { %s3421_s22 = smov %s3423_s26  ;;  %17 = sbr.rel (!%p15_p10) target bundleno = 4 (0x4), region = 176 }
 0x261   :  { %1594 = vsyncpa [#allocation4], 1 }
 0x262   :  { %1596 = vsyncpa [#allocation4 + $0x1], 1 }

</bundles_post_ra>
